<compile_context>
chip_gen: v7x
topology: tpu7x:2x2x1
jax: 0.10.0
libtpu: 0.0.40
codegen_flags: <defaults>
</compile_context>

<pallas_src>
import functools
import math

import jax
import jax.numpy as jnp
import numpy as np
from jax.experimental import pallas as pl
from jax.experimental.pallas import tpu as pltpu


# ----------------------------- in-kernel helpers -----------------------------

def _gelu_tanh(x):
    # tanh-approximate GELU: tanh goes to the EUP slot (frees VALU bundles);
    # max abs deviation from exact erf-GELU ~1e-3.
    c = 0.7978845608028654  # sqrt(2/pi)
    return 0.5 * x * (1.0 + jnp.tanh(c * (x + 0.044715 * x * x * x)))


def _layernorm(x, g, b, eps=1e-5):
    mu = jnp.mean(x, axis=-1, keepdims=True)
    xc = x - mu
    var = jnp.mean(xc * xc, axis=-1, keepdims=True)
    return xc * jax.lax.rsqrt(var + eps) * g + b


def _dot(a, b):
    return jnp.dot(a, b, preferred_element_type=jnp.float32)


# --------------------------------- kernel ------------------------------------

def _encoder_kernel(n_head,
                    x_ref, maskb_ref, wp_ref, bp_ref,
                    wqkv_ref, bqkv_ref, wo_ref, bo_ref,
                    ln1g_ref, ln1b_ref, ln2g_ref, ln2b_ref,
                    w1_ref, b1_ref, w2_ref, b2_ref,
                    o_ref, h_ref, ctx_ref):
    layer = pl.program_id(1)
    n_layer = pl.num_programs(1)

    Bt, S, Din = x_ref.shape
    D = h_ref.shape[-1]
    head_dim = D // n_head
    scale = 1.0 / math.sqrt(head_dim)
    M = Bt * S

    # ---- layer step 0: input projection Linear(in_dim, D); carried in h_ref ----
    # (One extra (M, D) VMEM store+load happens only at layer 0; kept instead of
    #  duplicating the whole layer body under two pl.when branches.)
    @pl.when(layer == 0)
    def _():
        xb = x_ref[...].reshape(M, Din)                          # bf16 from wrapper
        h_ref[...] = _dot(xb, wp_ref[...]) + bp_ref[...]         # f32 accum

    h = h_ref[...]                                               # (M, D) f32

    # ---------------- self attention (post-LN encoder layer) ----------------
    # Fused QKV: one (M, D) @ (D, 3D) bf16 MXU pass, one bias add.
    qkv = _dot(h.astype(jnp.bfloat16), wqkv_ref[0]) + bqkv_ref[0]     # (M, 3D) f32
    # fold 1/sqrt(head_dim) into q before the bf16 cast (intentional approx)
    q = (qkv[:, :D] * scale).astype(jnp.bfloat16).reshape(Bt, S, D)
    k = qkv[:, D:2 * D].astype(jnp.bfloat16).reshape(Bt, S, D)
    v = qkv[:, 2 * D:].astype(jnp.bfloat16).reshape(Bt, S, D)

    # Key-padding additive bias (0 / -1e9), broadcast once per layer step.
    bias = jnp.broadcast_to(maskb_ref[...], (Bt, S, S))               # (Bt, S, S)

    # Batched over Bt via the einsum batch dim; small static loop over heads.
    # Per-head context goes straight into the VMEM ctx scratch slice (no list
    # building / concatenation), so the out-projection is a single K=D matmul.
    for hh in range(n_head):
        cols = slice(hh * head_dim, (hh + 1) * head_dim)
        s = jnp.einsum('bqd,bkd->bqk', q[..., cols], k[..., cols],
                       preferred_element_type=jnp.float32) + bias     # (Bt, S, S)
        s = s - jnp.max(s, axis=-1, keepdims=True)
        p = jnp.exp(s)
        p = p * pl.reciprocal(jnp.sum(p, axis=-1, keepdims=True), approx=True)
        c = jnp.einsum('bqk,bkd->bqd', p.astype(jnp.bfloat16), v[..., cols],
                       preferred_element_type=jnp.float32)            # (Bt, S, hd)
        ctx_ref[:, cols] = c.reshape(M, head_dim).astype(ctx_ref.dtype)

    attn = _dot(ctx_ref[...], wo_ref[0]) + bo_ref[0]
    # dropout1 is identity in eval mode
    h = _layernorm(h + attn, ln1g_ref[0], ln1b_ref[0])

    # ---------------- feed forward: linear -> gelu -> linear ----------------
    ff = _dot(h.astype(jnp.bfloat16), w1_ref[0]) + b1_ref[0]
    ff = _gelu_tanh(ff)
    ff = _dot(ff.astype(jnp.bfloat16), w2_ref[0]) + b2_ref[0]
    # dropout2 is identity in eval mode
    h = _layernorm(h + ff, ln2g_ref[0], ln2b_ref[0])

    h_ref[...] = h                                               # carry to next layer step

    @pl.when(layer == n_layer - 1)
    def _():
        o_ref[...] = h.reshape(Bt, S, D).astype(o_ref.dtype)


# --------------------------------- wrapper -----------------------------------

_LAYER_WEIGHT_KEYS = ("wqkv", "bqkv", "wo", "bo",
                      "ln1g", "ln1b", "ln2g", "ln2b",
                      "w1", "b1", "w2", "b2")
_MXU_WEIGHT_KEYS = frozenset(("wp", "wqkv", "wo", "w1", "w2"))


def _nbytes(a):
    return int(np.prod(a.shape)) * jnp.dtype(a.dtype).itemsize


def _pick_block_b(B, S):
    # Fill the MXU M dimension: target M = block_b * S ~ 512 rows (>=256 on
    # v6e/v7x, >=128 on v5e).  On v7x pass block_b <= B//2 explicitly so the
    # "parallel" batch axis shards across both TensorCores; for tiny demo
    # batches the whole batch is one block.
    target_rows = 512
    bb = max(1, min(B, max(1, target_rows // max(S, 1))))
    while B % bb:
        bb -= 1
    return bb


def transformer_sequence_encoder(m, mask, params, n_head, *, block_b=None):
    """m: (S, B, in_dim) f32, mask: (B, S) bool (True == padding). Returns (S, B, D) f32."""
    S, B, Din = m.shape
    L, D = params["wqkv"].shape[0], params["wqkv"].shape[1]
    assert D % n_head == 0

    if block_b is None:
        block_b = _pick_block_b(B, S)
    assert B % block_b == 0
    n_b = B // block_b

    # Input in bf16 (halves the x DMA; MXU consumes bf16 anyway).
    x = jnp.transpose(m, (1, 0, 2)).astype(jnp.bfloat16)                  # (B, S, Din)
    mask_bias = jnp.where(mask, -1e9, 0.0).astype(jnp.float32)[:, None]   # (B, 1, S)

    # bf16 for MXU-feeding weights; biases / LayerNorm params stay f32.
    def cast(kk):
        w = params[kk]
        return w.astype(jnp.bfloat16) if kk in _MXU_WEIGHT_KEYS else w

    wp, bp = cast("wp"), params["bp"]
    layer_weights = [cast(kk) for kk in _LAYER_WEIGHT_KEYS]

    def const_spec(w):        # constant block across the whole grid
        nd = w.ndim
        return pl.BlockSpec(w.shape, lambda b, l, _nd=nd: (0,) * _nd)

    def layer_spec(w):        # stream one layer's slice per step along the l axis
        # NOTE(v5e): if VMEM permits, pipeline_mode=pl.Buffered(3) here hides
        # more of the weight-stream latency on the bandwidth-poorest generation.
        nd = w.ndim
        return pl.BlockSpec((1,) + w.shape[1:],
                            lambda b, l, _nd=nd: (l,) + (0,) * (_nd - 1))

    grid_spec = pltpu.PrefetchScalarGridSpec(
        num_scalar_prefetch=0,
        grid=(n_b, L),
        in_specs=[pl.BlockSpec((block_b, S, Din), lambda b, l: (b, 0, 0)),
                  pl.BlockSpec((block_b, 1, S), lambda b, l: (b, 0, 0)),
                  const_spec(wp), const_spec(bp)]
                 + [layer_spec(w) for w in layer_weights],
        out_specs=pl.BlockSpec((block_b, S, D), lambda b, l: (b, 0, 0)),
        scratch_shapes=[pltpu.VMEM((block_b * S, D), jnp.float32),        # carried h
                        pltpu.VMEM((block_b * S, D), jnp.bfloat16)],      # attn ctx
    )

    # VMEM budget: double-buffered per-layer weight slice + I/O blocks + consts
    # + scratches, with headroom; capped by the physical per-core VMEM capacity
    # (v7x has only 64 MiB per TensorCore).
    per_layer = sum(_nbytes(w) // w.shape[0] for w in layer_weights)
    x_blk = block_b * S * Din * 2
    msk_blk = block_b * S * 4
    out_blk = block_b * S * D * 4
    consts = _nbytes(wp) + _nbytes(bp)
    scratch = block_b * S * D * (4 + 2)
    est = 2 * (per_layer + x_blk + msk_blk + out_blk + consts) + scratch
    try:
        cap = int(pltpu.get_tpu_info().vmem_capacity_bytes)
    except Exception:
        cap = 64 * 2**20
    budget = (cap * 3) // 4
    vmem_limit = int(min(budget, max(32 * 2**20, 4 * est)))

    out = pl.pallas_call(
        functools.partial(_encoder_kernel, n_head),
        out_shape=jax.ShapeDtypeStruct((B, S, D), jnp.float32),
        grid_spec=grid_spec,
        compiler_params=pltpu.CompilerParams(
            dimension_semantics=("parallel", "arbitrary"),
            vmem_limit_bytes=vmem_limit),
    )(x, mask_bias, wp, bp, *layer_weights)

    return jnp.transpose(out, (1, 0, 2))                                  # (S, B, D)


# ------------------------- deterministic parameter init ----------------------

def make_params(key, in_dim, hidden_dim, ffn_dim, n_layer):
    L, D, F = n_layer, hidden_dim, ffn_dim
    ks = jax.random.split(key, 8)

    def rn(k, shape, s):
        return s * jax.random.normal(k, shape, dtype=jnp.float32)

    sd_in, sd_d, sd_f = 1.0 / math.sqrt(in_dim), 1.0 / math.sqrt(D), 1.0 / math.sqrt(F)
    return dict(
        wp=rn(ks[0], (in_dim, D), sd_in),    bp=rn(ks[1], (1, D), 0.1),
        wqkv=rn(ks[2], (L, D, 3 * D), sd_d), bqkv=rn(ks[3], (L, 1, 3 * D), 0.1),
        wo=rn(ks[4], (L, D, D), sd_d),       bo=rn(ks[5], (L, 1, D), 0.1),
        ln1g=jnp.ones((L, 1, D), jnp.float32), ln1b=jnp.zeros((L, 1, D), jnp.float32),
        ln2g=jnp.ones((L, 1, D), jnp.float32), ln2b=jnp.zeros((L, 1, D), jnp.float32),
        w1=rn(ks[6], (L, D, F), sd_d),       b1=jnp.zeros((L, 1, F), jnp.float32),
        w2=rn(ks[7], (L, F, D), sd_f),       b2=jnp.zeros((L, 1, D), jnp.float32),
    )


# ------------------------------ pure-JAX reference ---------------------------

def reference(m, mask, params, n_head):
    # Weights rounded to bf16 to match the kernel's MXU input precision;
    # activations / LN / softmax stay in f32, GELU is exact (erf).
    w = lambda t: t.astype(jnp.bfloat16).astype(jnp.float32)
    h = jnp.transpose(m, (1, 0, 2)).astype(jnp.float32) @ w(params["wp"]) + params["bp"]
    mask_bias = jnp.where(mask, -1e9, 0.0)[:, None, None, :]   # (B,1,1,S)
    L, D = params["wqkv"].shape[0], params["wo"].shape[-1]
    hd = D // n_head
    for l in range(L):
        qkv = h @ w(params["wqkv"][l]) + params["bqkv"][l]
        q, k, v = qkv[..., :D], qkv[..., D:2 * D], qkv[..., 2 * D:]

        def split(t):
            B_, S_, _ = t.shape
            return t.reshape(B_, S_, n_head, hd).transpose(0, 2, 1, 3)

        s = jnp.einsum("bhqd,bhkd->bhqk", split(q), split(k)) / math.sqrt(hd) + mask_bias
        p = jax.nn.softmax(s, axis=-1)
        o = jnp.einsum("bhqk,bhkd->bhqd", p, split(v)).transpose(0, 2, 1, 3).reshape(h.shape)
        attn = o @ w(params["wo"][l]) + params["bo"][l]
        h = _layernorm(h + attn, params["ln1g"][l], params["ln1b"][l])
        ff = jax.nn.gelu(h @ w(params["w1"][l]) + params["b1"][l], approximate=False)
        ff = ff @ w(params["w2"][l]) + params["b2"][l]
        h = _layernorm(h + ff, params["ln2g"][l], params["ln2b"][l])
    return jnp.transpose(h, (1, 0, 2))


# ----------------------------------- main -------------------------------------

if __name__ == "__main__":
    # TODO(synk): dropout is modeled as eval-mode identity (training dropout not implemented).
    # TODO(synk): a fully padded sequence produces finite garbage rows (uniform softmax over
    # padded keys) instead of PyTorch's NaN behavior; guard upstream if that can occur.
    S, B = 8, 2
    # lane-dense dims: d_model and dim_feedforward multiples of 128, S multiple of 8
    in_dim, hidden_dim, out_dim, n_head, n_layer = 16, 128, 128, 4, 2

    key = jax.random.PRNGKey(0)
    k_m, k_p = jax.random.split(key)
    m = jax.random.normal(k_m, (S, B, in_dim), dtype=jnp.float32)
    lengths = jnp.array([8, 5], dtype=jnp.int32)
    mask = jnp.arange(S)[None, :] >= lengths[:, None]           # (B, S) bool, True = pad

    params = make_params(k_p, in_dim, hidden_dim, out_dim, n_layer)

    out = transformer_sequence_encoder(m, mask, params, n_head)
    out = jax.block_until_ready(out)

    assert out.shape == (S, B, hidden_dim)
    assert bool(jnp.all(jnp.isfinite(out)))

    ref = reference(m, mask, params, n_head)
    # Kernel feeds the MXU bf16 inputs/activations (f32 accumulation), folds 1/sqrt(hd)
    # into q pre-cast, and uses approx-reciprocal softmax + tanh-GELU; the reference keeps
    # f32 activations and exact GELU -> expect ~1e-2-scale differences; tolerance set so.
    np.testing.assert_allclose(np.asarray(out), np.asarray(ref), atol=1e-1, rtol=1e-1)

    print("KERNEL_OK")
</pallas_src>

<mosaic_0001>
module attributes {stable_mosaic.version = 11 : i64} {
  func.func @_encoder_kernel(%arg0: i32, %arg1: i32, %arg2: memref<2x8x16xbf16, #tpu.memory_space<vmem>>, %arg3: memref<2x1x8xf32, #tpu.memory_space<vmem>>, %arg4: memref<16x128xbf16, #tpu.memory_space<vmem>>, %arg5: memref<1x128xf32, #tpu.memory_space<vmem>>, %arg6: memref<1x128x384xbf16, #tpu.memory_space<vmem>>, %arg7: memref<1x1x384xf32, #tpu.memory_space<vmem>>, %arg8: memref<1x128x128xbf16, #tpu.memory_space<vmem>>, %arg9: memref<1x1x128xf32, #tpu.memory_space<vmem>>, %arg10: memref<1x1x128xf32, #tpu.memory_space<vmem>>, %arg11: memref<1x1x128xf32, #tpu.memory_space<vmem>>, %arg12: memref<1x1x128xf32, #tpu.memory_space<vmem>>, %arg13: memref<1x1x128xf32, #tpu.memory_space<vmem>>, %arg14: memref<1x128x128xbf16, #tpu.memory_space<vmem>>, %arg15: memref<1x1x128xf32, #tpu.memory_space<vmem>>, %arg16: memref<1x128x128xbf16, #tpu.memory_space<vmem>>, %arg17: memref<1x1x128xf32, #tpu.memory_space<vmem>>, %arg18: memref<2x8x128xf32, #tpu.memory_space<vmem>>, %arg19: memref<16x128xf32, #tpu.memory_space<vmem>>, %arg20: memref<16x128xbf16, #tpu.memory_space<vmem>>) attributes {dimension_semantics = [#tpu.dimension_semantics<parallel>, #tpu.dimension_semantics<arbitrary>], iteration_bounds = array<i64: 1, 2>, scalar_prefetch = 0 : i64, scratch_operands = 2 : i64, tpu.core_type = #tpu.core_type<tc>, window_params = [{transform_indices = @transform_0, window_bounds = array<i64: 2, 8, 16>}, {transform_indices = @transform_1, window_bounds = array<i64: 2, 1, 8>}, {pipeline_mode = #tpu.pipeline_mode<synchronous>, transform_indices = @transform_2, window_bounds = array<i64: 16, 128>}, {pipeline_mode = #tpu.pipeline_mode<synchronous>, transform_indices = @transform_3, window_bounds = array<i64: 1, 128>}, {transform_indices = @transform_4, window_bounds = array<i64: 1, 128, 384>}, {transform_indices = @transform_5, window_bounds = array<i64: 1, 1, 384>}, {transform_indices = @transform_6, window_bounds = array<i64: 1, 128, 128>}, {transform_indices = @transform_7, window_bounds = array<i64: 1, 1, 128>}, {transform_indices = @transform_8, window_bounds = array<i64: 1, 1, 128>}, {transform_indices = @transform_9, window_bounds = array<i64: 1, 1, 128>}, {transform_indices = @transform_10, window_bounds = array<i64: 1, 1, 128>}, {transform_indices = @transform_11, window_bounds = array<i64: 1, 1, 128>}, {transform_indices = @transform_12, window_bounds = array<i64: 1, 128, 128>}, {transform_indices = @transform_13, window_bounds = array<i64: 1, 1, 128>}, {transform_indices = @transform_14, window_bounds = array<i64: 1, 128, 128>}, {transform_indices = @transform_15, window_bounds = array<i64: 1, 1, 128>}, {transform_indices = @transform_16, window_bounds = array<i64: 2, 8, 128>}]} {
    %c0_i32 = arith.constant 0 : i32
    %0 = arith.cmpi eq, %arg1, %c0_i32 : i32
    %1 = arith.extui %0 : i1 to i32
    %c0_i32_0 = arith.constant 0 : i32
    %2 = arith.cmpi ne, %1, %c0_i32_0 : i32
    scf.if %2 {
      %c0_85 = arith.constant 0 : index
      %c0_86 = arith.constant 0 : index
      %c0_87 = arith.constant 0 : index
      %197 = vector.load %arg2[%c0_85, %c0_86, %c0_87] : memref<2x8x16xbf16, #tpu.memory_space<vmem>>, vector<2x8x16xbf16>
      %198 = vector.shape_cast %197 : vector<2x8x16xbf16> to vector<16x16xbf16>
      %c0_88 = arith.constant 0 : index
      %c0_89 = arith.constant 0 : index
      %199 = vector.load %arg4[%c0_88, %c0_89] : memref<16x128xbf16, #tpu.memory_space<vmem>>, vector<16x128xbf16>
      %cst_90 = arith.constant dense<0.000000e+00> : vector<16x128xf32>
      %200 = tpu.matmul %198, %199, %cst_90 {dimension_numbers = #tpu.dot_dimension_numbers<[1], [0], [0], [1], [0, 0, 1, 1], [], []>} : vector<16x16xbf16>, vector<16x128xbf16>, vector<16x128xf32> -> vector<16x128xf32>
      %c0_91 = arith.constant 0 : index
      %c0_92 = arith.constant 0 : index
      %201 = vector.load %arg5[%c0_91, %c0_92] : memref<1x128xf32, #tpu.memory_space<vmem>>, vector<1x128xf32>
      %202 = vector.broadcast %201 : vector<1x128xf32> to vector<16x128xf32>
      %203 = arith.addf %200, %202 : vector<16x128xf32>
      %c0_93 = arith.constant 0 : index
      %c0_94 = arith.constant 0 : index
      %204 = vector.load %arg19[%c0_93, %c0_94] : memref<16x128xf32, #tpu.memory_space<vmem>>, vector<16x128xf32>
      tpu.vector_store %arg19[%c0_93, %c0_94], %203 {strides = array<i32>} : memref<16x128xf32, #tpu.memory_space<vmem>>, vector<16x128xf32>,
    } else {
    }
    %c0 = arith.constant 0 : index
    %c0_1 = arith.constant 0 : index
    %3 = vector.load %arg19[%c0, %c0_1] : memref<16x128xf32, #tpu.memory_space<vmem>>, vector<16x128xf32>
    %4 = arith.truncf %3 : vector<16x128xf32> to vector<16x128xbf16>
    %c0_2 = arith.constant 0 : index
    %c0_3 = arith.constant 0 : index
    %c0_4 = arith.constant 0 : index
    %5 = vector.load %arg6[%c0_2, %c0_3, %c0_4] : memref<1x128x384xbf16, #tpu.memory_space<vmem>>, vector<1x128x384xbf16>
    %6 = vector.shape_cast %5 : vector<1x128x384xbf16> to vector<128x384xbf16>
    %cst = arith.constant dense<0.000000e+00> : vector<16x384xf32>
    %7 = tpu.matmul %4, %6, %cst {dimension_numbers = #tpu.dot_dimension_numbers<[1], [0], [0], [1], [0, 0, 1, 1], [], []>} : vector<16x128xbf16>, vector<128x384xbf16>, vector<16x384xf32> -> vector<16x384xf32>
    %c0_5 = arith.constant 0 : index
    %c0_6 = arith.constant 0 : index
    %c0_7 = arith.constant 0 : index
    %8 = vector.load %arg7[%c0_5, %c0_6, %c0_7] : memref<1x1x384xf32, #tpu.memory_space<vmem>>, vector<1x1x384xf32>
    %9 = vector.shape_cast %8 : vector<1x1x384xf32> to vector<1x384xf32>
    %10 = vector.broadcast %9 : vector<1x384xf32> to vector<16x384xf32>
    %11 = arith.addf %7, %10 : vector<16x384xf32>
    %12 = vector.extract_strided_slice %11 {offsets = [0, 0], sizes = [16, 128], strides = [1, 1]} : vector<16x384xf32> to vector<16x128xf32>
    %cst_8 = arith.constant 0.176776692 : f32
    %13 = vector.broadcast %cst_8 : f32 to vector<16x128xf32>
    %14 = arith.mulf %12, %13 : vector<16x128xf32>
    %15 = arith.truncf %14 : vector<16x128xf32> to vector<16x128xbf16>
    %16 = vector.shape_cast %15 : vector<16x128xbf16> to vector<2x8x128xbf16>
    %17 = vector.extract_strided_slice %11 {offsets = [0, 128], sizes = [16, 128], strides = [1, 1]} : vector<16x384xf32> to vector<16x128xf32>
    %18 = arith.truncf %17 : vector<16x128xf32> to vector<16x128xbf16>
    %19 = vector.shape_cast %18 : vector<16x128xbf16> to vector<2x8x128xbf16>
    %20 = vector.extract_strided_slice %11 {offsets = [0, 256], sizes = [16, 128], strides = [1, 1]} : vector<16x384xf32> to vector<16x128xf32>
    %21 = arith.truncf %20 : vector<16x128xf32> to vector<16x128xbf16>
    %22 = vector.shape_cast %21 : vector<16x128xbf16> to vector<2x8x128xbf16>
    %c0_9 = arith.constant 0 : index
    %c0_10 = arith.constant 0 : index
    %c0_11 = arith.constant 0 : index
    %23 = vector.load %arg3[%c0_9, %c0_10, %c0_11] : memref<2x1x8xf32, #tpu.memory_space<vmem>>, vector<2x1x8xf32>
    %24 = vector.shape_cast %23 : vector<2x1x8xf32> to vector<2x1x8xf32>
    %25 = vector.broadcast %24 : vector<2x1x8xf32> to vector<2x8x8xf32>
    %26 = vector.extract_strided_slice %16 {offsets = [0, 0, 0], sizes = [2, 8, 32], strides = [1, 1, 1]} : vector<2x8x128xbf16> to vector<2x8x32xbf16>
    %27 = vector.extract_strided_slice %19 {offsets = [0, 0, 0], sizes = [2, 8, 32], strides = [1, 1, 1]} : vector<2x8x128xbf16> to vector<2x8x32xbf16>
    "tpu.trace_start"() <{level = 10 : i32, message = "bqd,bkd->bqk"}> : () -> ()
    %cst_12 = arith.constant dense<0.000000e+00> : vector<2x8x8xf32>
    %28 = tpu.matmul %26, %27, %cst_12 {dimension_numbers = #tpu.dot_dimension_numbers<[2], [2], [1], [1], [0, 0, 0, 1, 1, 1], [0], [0]>} : vector<2x8x32xbf16>, vector<2x8x32xbf16>, vector<2x8x8xf32> -> vector<2x8x8xf32>
    "tpu.trace_stop"() : () -> ()
    %29 = arith.addf %28, %25 : vector<2x8x8xf32>
    %cst_13 = arith.constant dense<0xFF800000> : vector<2x8xf32>
    %30 = vector.multi_reduction <maximumf>, %29, %cst_13 [2] : vector<2x8x8xf32> to vector<2x8xf32>
    %31 = vector.shape_cast %30 : vector<2x8xf32> to vector<2x8x1xf32>
    %32 = vector.broadcast %31 : vector<2x8x1xf32> to vector<2x8x8xf32>
    %33 = arith.subf %29, %32 : vector<2x8x8xf32>
    %34 = math.exp %33 : vector<2x8x8xf32>
    %cst_14 = arith.constant dense<0.000000e+00> : vector<2x8xf32>
    %35 = vector.multi_reduction <add>, %34, %cst_14 [2] : vector<2x8x8xf32> to vector<2x8xf32>
    %36 = vector.shape_cast %35 : vector<2x8xf32> to vector<2x8x1xf32>
    %37 = tpu.reciprocal %36 {approx = true} : vector<2x8x1xf32> -> vector<2x8x1xf32>
    %38 = vector.broadcast %37 : vector<2x8x1xf32> to vector<2x8x8xf32>
    %39 = arith.mulf %34, %38 : vector<2x8x8xf32>
    %40 = arith.truncf %39 : vector<2x8x8xf32> to vector<2x8x8xbf16>
    %41 = vector.extract_strided_slice %22 {offsets = [0, 0, 0], sizes = [2, 8, 32], strides = [1, 1, 1]} : vector<2x8x128xbf16> to vector<2x8x32xbf16>
    "tpu.trace_start"() <{level = 10 : i32, message = "bqk,bkd->bqd"}> : () -> ()
    %cst_15 = arith.constant dense<0.000000e+00> : vector<2x8x32xf32>
    %42 = tpu.matmul %40, %41, %cst_15 {dimension_numbers = #tpu.dot_dimension_numbers<[2], [1], [1], [2], [0, 0, 0, 1, 1, 2], [0], [0]>} : vector<2x8x8xbf16>, vector<2x8x32xbf16>, vector<2x8x32xf32> -> vector<2x8x32xf32>
    "tpu.trace_stop"() : () -> ()
    %43 = vector.shape_cast %42 : vector<2x8x32xf32> to vector<16x32xf32>
    %44 = arith.truncf %43 : vector<16x32xf32> to vector<16x32xbf16>
    %c0_16 = arith.constant 0 : index
    %c0_17 = arith.constant 0 : index
    %45 = vector.load %arg20[%c0_16, %c0_17] : memref<16x128xbf16, #tpu.memory_space<vmem>>, vector<16x32xbf16>
    tpu.vector_store %arg20[%c0_16, %c0_17], %44 {strides = array<i32>} : memref<16x128xbf16, #tpu.memory_space<vmem>>, vector<16x32xbf16>,
    %46 = vector.extract_strided_slice %16 {offsets = [0, 0, 32], sizes = [2, 8, 32], strides = [1, 1, 1]} : vector<2x8x128xbf16> to vector<2x8x32xbf16>
    %47 = vector.extract_strided_slice %19 {offsets = [0, 0, 32], sizes = [2, 8, 32], strides = [1, 1, 1]} : vector<2x8x128xbf16> to vector<2x8x32xbf16>
    "tpu.trace_start"() <{level = 10 : i32, message = "bqd,bkd->bqk"}> : () -> ()
    %cst_18 = arith.constant dense<0.000000e+00> : vector<2x8x8xf32>
    %48 = tpu.matmul %46, %47, %cst_18 {dimension_numbers = #tpu.dot_dimension_numbers<[2], [2], [1], [1], [0, 0, 0, 1, 1, 1], [0], [0]>} : vector<2x8x32xbf16>, vector<2x8x32xbf16>, vector<2x8x8xf32> -> vector<2x8x8xf32>
    "tpu.trace_stop"() : () -> ()
    %49 = arith.addf %48, %25 : vector<2x8x8xf32>
    %cst_19 = arith.constant dense<0xFF800000> : vector<2x8xf32>
    %50 = vector.multi_reduction <maximumf>, %49, %cst_19 [2] : vector<2x8x8xf32> to vector<2x8xf32>
    %51 = vector.shape_cast %50 : vector<2x8xf32> to vector<2x8x1xf32>
    %52 = vector.broadcast %51 : vector<2x8x1xf32> to vector<2x8x8xf32>
    %53 = arith.subf %49, %52 : vector<2x8x8xf32>
    %54 = math.exp %53 : vector<2x8x8xf32>
    %cst_20 = arith.constant dense<0.000000e+00> : vector<2x8xf32>
    %55 = vector.multi_reduction <add>, %54, %cst_20 [2] : vector<2x8x8xf32> to vector<2x8xf32>
    %56 = vector.shape_cast %55 : vector<2x8xf32> to vector<2x8x1xf32>
    %57 = tpu.reciprocal %56 {approx = true} : vector<2x8x1xf32> -> vector<2x8x1xf32>
    %58 = vector.broadcast %57 : vector<2x8x1xf32> to vector<2x8x8xf32>
    %59 = arith.mulf %54, %58 : vector<2x8x8xf32>
    %60 = arith.truncf %59 : vector<2x8x8xf32> to vector<2x8x8xbf16>
    %61 = vector.extract_strided_slice %22 {offsets = [0, 0, 32], sizes = [2, 8, 32], strides = [1, 1, 1]} : vector<2x8x128xbf16> to vector<2x8x32xbf16>
    "tpu.trace_start"() <{level = 10 : i32, message = "bqk,bkd->bqd"}> : () -> ()
    %cst_21 = arith.constant dense<0.000000e+00> : vector<2x8x32xf32>
    %62 = tpu.matmul %60, %61, %cst_21 {dimension_numbers = #tpu.dot_dimension_numbers<[2], [1], [1], [2], [0, 0, 0, 1, 1, 2], [0], [0]>} : vector<2x8x8xbf16>, vector<2x8x32xbf16>, vector<2x8x32xf32> -> vector<2x8x32xf32>
    "tpu.trace_stop"() : () -> ()
    %63 = vector.shape_cast %62 : vector<2x8x32xf32> to vector<16x32xf32>
    %64 = arith.truncf %63 : vector<16x32xf32> to vector<16x32xbf16>
    %c0_22 = arith.constant 0 : index
    %c32 = arith.constant 32 : index
    %65 = vector.load %arg20[%c0_22, %c32] : memref<16x128xbf16, #tpu.memory_space<vmem>>, vector<16x32xbf16>
    tpu.vector_store %arg20[%c0_22, %c32], %64 {strides = array<i32>} : memref<16x128xbf16, #tpu.memory_space<vmem>>, vector<16x32xbf16>,
    %66 = vector.extract_strided_slice %16 {offsets = [0, 0, 64], sizes = [2, 8, 32], strides = [1, 1, 1]} : vector<2x8x128xbf16> to vector<2x8x32xbf16>
    %67 = vector.extract_strided_slice %19 {offsets = [0, 0, 64], sizes = [2, 8, 32], strides = [1, 1, 1]} : vector<2x8x128xbf16> to vector<2x8x32xbf16>
    "tpu.trace_start"() <{level = 10 : i32, message = "bqd,bkd->bqk"}> : () -> ()
    %cst_23 = arith.constant dense<0.000000e+00> : vector<2x8x8xf32>
    %68 = tpu.matmul %66, %67, %cst_23 {dimension_numbers = #tpu.dot_dimension_numbers<[2], [2], [1], [1], [0, 0, 0, 1, 1, 1], [0], [0]>} : vector<2x8x32xbf16>, vector<2x8x32xbf16>, vector<2x8x8xf32> -> vector<2x8x8xf32>
    "tpu.trace_stop"() : () -> ()
    %69 = arith.addf %68, %25 : vector<2x8x8xf32>
    %cst_24 = arith.constant dense<0xFF800000> : vector<2x8xf32>
    %70 = vector.multi_reduction <maximumf>, %69, %cst_24 [2] : vector<2x8x8xf32> to vector<2x8xf32>
    %71 = vector.shape_cast %70 : vector<2x8xf32> to vector<2x8x1xf32>
    %72 = vector.broadcast %71 : vector<2x8x1xf32> to vector<2x8x8xf32>
    %73 = arith.subf %69, %72 : vector<2x8x8xf32>
    %74 = math.exp %73 : vector<2x8x8xf32>
    %cst_25 = arith.constant dense<0.000000e+00> : vector<2x8xf32>
    %75 = vector.multi_reduction <add>, %74, %cst_25 [2] : vector<2x8x8xf32> to vector<2x8xf32>
    %76 = vector.shape_cast %75 : vector<2x8xf32> to vector<2x8x1xf32>
    %77 = tpu.reciprocal %76 {approx = true} : vector<2x8x1xf32> -> vector<2x8x1xf32>
    %78 = vector.broadcast %77 : vector<2x8x1xf32> to vector<2x8x8xf32>
    %79 = arith.mulf %74, %78 : vector<2x8x8xf32>
    %80 = arith.truncf %79 : vector<2x8x8xf32> to vector<2x8x8xbf16>
    %81 = vector.extract_strided_slice %22 {offsets = [0, 0, 64], sizes = [2, 8, 32], strides = [1, 1, 1]} : vector<2x8x128xbf16> to vector<2x8x32xbf16>
    "tpu.trace_start"() <{level = 10 : i32, message = "bqk,bkd->bqd"}> : () -> ()
    %cst_26 = arith.constant dense<0.000000e+00> : vector<2x8x32xf32>
    %82 = tpu.matmul %80, %81, %cst_26 {dimension_numbers = #tpu.dot_dimension_numbers<[2], [1], [1], [2], [0, 0, 0, 1, 1, 2], [0], [0]>} : vector<2x8x8xbf16>, vector<2x8x32xbf16>, vector<2x8x32xf32> -> vector<2x8x32xf32>
    "tpu.trace_stop"() : () -> ()
    %83 = vector.shape_cast %82 : vector<2x8x32xf32> to vector<16x32xf32>
    %84 = arith.truncf %83 : vector<16x32xf32> to vector<16x32xbf16>
    %c0_27 = arith.constant 0 : index
    %c64 = arith.constant 64 : index
    %85 = vector.load %arg20[%c0_27, %c64] : memref<16x128xbf16, #tpu.memory_space<vmem>>, vector<16x32xbf16>
    tpu.vector_store %arg20[%c0_27, %c64], %84 {strides = array<i32>} : memref<16x128xbf16, #tpu.memory_space<vmem>>, vector<16x32xbf16>,
    %86 = vector.extract_strided_slice %16 {offsets = [0, 0, 96], sizes = [2, 8, 32], strides = [1, 1, 1]} : vector<2x8x128xbf16> to vector<2x8x32xbf16>
    %87 = vector.extract_strided_slice %19 {offsets = [0, 0, 96], sizes = [2, 8, 32], strides = [1, 1, 1]} : vector<2x8x128xbf16> to vector<2x8x32xbf16>
    "tpu.trace_start"() <{level = 10 : i32, message = "bqd,bkd->bqk"}> : () -> ()
    %cst_28 = arith.constant dense<0.000000e+00> : vector<2x8x8xf32>
    %88 = tpu.matmul %86, %87, %cst_28 {dimension_numbers = #tpu.dot_dimension_numbers<[2], [2], [1], [1], [0, 0, 0, 1, 1, 1], [0], [0]>} : vector<2x8x32xbf16>, vector<2x8x32xbf16>, vector<2x8x8xf32> -> vector<2x8x8xf32>
    "tpu.trace_stop"() : () -> ()
    %89 = arith.addf %88, %25 : vector<2x8x8xf32>
    %cst_29 = arith.constant dense<0xFF800000> : vector<2x8xf32>
    %90 = vector.multi_reduction <maximumf>, %89, %cst_29 [2] : vector<2x8x8xf32> to vector<2x8xf32>
    %91 = vector.shape_cast %90 : vector<2x8xf32> to vector<2x8x1xf32>
    %92 = vector.broadcast %91 : vector<2x8x1xf32> to vector<2x8x8xf32>
    %93 = arith.subf %89, %92 : vector<2x8x8xf32>
    %94 = math.exp %93 : vector<2x8x8xf32>
    %cst_30 = arith.constant dense<0.000000e+00> : vector<2x8xf32>
    %95 = vector.multi_reduction <add>, %94, %cst_30 [2] : vector<2x8x8xf32> to vector<2x8xf32>
    %96 = vector.shape_cast %95 : vector<2x8xf32> to vector<2x8x1xf32>
    %97 = tpu.reciprocal %96 {approx = true} : vector<2x8x1xf32> -> vector<2x8x1xf32>
    %98 = vector.broadcast %97 : vector<2x8x1xf32> to vector<2x8x8xf32>
    %99 = arith.mulf %94, %98 : vector<2x8x8xf32>
    %100 = arith.truncf %99 : vector<2x8x8xf32> to vector<2x8x8xbf16>
    %101 = vector.extract_strided_slice %22 {offsets = [0, 0, 96], sizes = [2, 8, 32], strides = [1, 1, 1]} : vector<2x8x128xbf16> to vector<2x8x32xbf16>
    "tpu.trace_start"() <{level = 10 : i32, message = "bqk,bkd->bqd"}> : () -> ()
    %cst_31 = arith.constant dense<0.000000e+00> : vector<2x8x32xf32>
    %102 = tpu.matmul %100, %101, %cst_31 {dimension_numbers = #tpu.dot_dimension_numbers<[2], [1], [1], [2], [0, 0, 0, 1, 1, 2], [0], [0]>} : vector<2x8x8xbf16>, vector<2x8x32xbf16>, vector<2x8x32xf32> -> vector<2x8x32xf32>
    "tpu.trace_stop"() : () -> ()
    %103 = vector.shape_cast %102 : vector<2x8x32xf32> to vector<16x32xf32>
    %104 = arith.truncf %103 : vector<16x32xf32> to vector<16x32xbf16>
    %c0_32 = arith.constant 0 : index
    %c96 = arith.constant 96 : index
    %105 = vector.load %arg20[%c0_32, %c96] : memref<16x128xbf16, #tpu.memory_space<vmem>>, vector<16x32xbf16>
    tpu.vector_store %arg20[%c0_32, %c96], %104 {strides = array<i32>} : memref<16x128xbf16, #tpu.memory_space<vmem>>, vector<16x32xbf16>,
    %c0_33 = arith.constant 0 : index
    %c0_34 = arith.constant 0 : index
    %106 = vector.load %arg20[%c0_33, %c0_34] : memref<16x128xbf16, #tpu.memory_space<vmem>>, vector<16x128xbf16>
    %c0_35 = arith.constant 0 : index
    %c0_36 = arith.constant 0 : index
    %c0_37 = arith.constant 0 : index
    %107 = vector.load %arg8[%c0_35, %c0_36, %c0_37] : memref<1x128x128xbf16, #tpu.memory_space<vmem>>, vector<1x128x128xbf16>
    %108 = vector.shape_cast %107 : vector<1x128x128xbf16> to vector<128x128xbf16>
    %cst_38 = arith.constant dense<0.000000e+00> : vector<16x128xf32>
    %109 = tpu.matmul %106, %108, %cst_38 {dimension_numbers = #tpu.dot_dimension_numbers<[1], [0], [0], [1], [0, 0, 1, 1], [], []>} : vector<16x128xbf16>, vector<128x128xbf16>, vector<16x128xf32> -> vector<16x128xf32>
    %c0_39 = arith.constant 0 : index
    %c0_40 = arith.constant 0 : index
    %c0_41 = arith.constant 0 : index
    %110 = vector.load %arg9[%c0_39, %c0_40, %c0_41] : memref<1x1x128xf32, #tpu.memory_space<vmem>>, vector<1x1x128xf32>
    %111 = vector.shape_cast %110 : vector<1x1x128xf32> to vector<1x128xf32>
    %112 = vector.broadcast %111 : vector<1x128xf32> to vector<16x128xf32>
    %113 = arith.addf %109, %112 : vector<16x128xf32>
    %114 = arith.addf %3, %113 : vector<16x128xf32>
    %c0_42 = arith.constant 0 : index
    %c0_43 = arith.constant 0 : index
    %c0_44 = arith.constant 0 : index
    %115 = vector.load %arg10[%c0_42, %c0_43, %c0_44] : memref<1x1x128xf32, #tpu.memory_space<vmem>>, vector<1x1x128xf32>
    %116 = vector.shape_cast %115 : vector<1x1x128xf32> to vector<1x128xf32>
    %c0_45 = arith.constant 0 : index
    %c0_46 = arith.constant 0 : index
    %c0_47 = arith.constant 0 : index
    %117 = vector.load %arg11[%c0_45, %c0_46, %c0_47] : memref<1x1x128xf32, #tpu.memory_space<vmem>>, vector<1x1x128xf32>
    %118 = vector.shape_cast %117 : vector<1x1x128xf32> to vector<1x128xf32>
    %cst_48 = arith.constant dense<0.000000e+00> : vector<16xf32>
    %119 = vector.multi_reduction <add>, %114, %cst_48 [1] : vector<16x128xf32> to vector<16xf32>
    %120 = vector.shape_cast %119 : vector<16xf32> to vector<16x1xf32>
    %cst_49 = arith.constant 1.280000e+02 : f32
    %121 = vector.broadcast %cst_49 : f32 to vector<16x1xf32>
    %122 = arith.divf %120, %121 : vector<16x1xf32>
    %123 = vector.broadcast %122 : vector<16x1xf32> to vector<16x128xf32>
    %124 = arith.subf %114, %123 : vector<16x128xf32>
    %125 = arith.mulf %124, %124 : vector<16x128xf32>
    %cst_50 = arith.constant dense<0.000000e+00> : vector<16xf32>
    %126 = vector.multi_reduction <add>, %125, %cst_50 [1] : vector<16x128xf32> to vector<16xf32>
    %127 = vector.shape_cast %126 : vector<16xf32> to vector<16x1xf32>
    %cst_51 = arith.constant 1.280000e+02 : f32
    %128 = vector.broadcast %cst_51 : f32 to vector<16x1xf32>
    %129 = arith.divf %127, %128 : vector<16x1xf32>
    %cst_52 = arith.constant 9.99999974E-6 : f32
    %130 = vector.broadcast %cst_52 : f32 to vector<16x1xf32>
    %131 = arith.addf %129, %130 : vector<16x1xf32>
    %132 = math.rsqrt %131 : vector<16x1xf32>
    %133 = vector.broadcast %132 : vector<16x1xf32> to vector<16x128xf32>
    %134 = arith.mulf %124, %133 : vector<16x128xf32>
    %135 = vector.broadcast %116 : vector<1x128xf32> to vector<16x128xf32>
    %136 = arith.mulf %134, %135 : vector<16x128xf32>
    %137 = vector.broadcast %118 : vector<1x128xf32> to vector<16x128xf32>
    %138 = arith.addf %136, %137 : vector<16x128xf32>
    %139 = arith.truncf %138 : vector<16x128xf32> to vector<16x128xbf16>
    %c0_53 = arith.constant 0 : index
    %c0_54 = arith.constant 0 : index
    %c0_55 = arith.constant 0 : index
    %140 = vector.load %arg14[%c0_53, %c0_54, %c0_55] : memref<1x128x128xbf16, #tpu.memory_space<vmem>>, vector<1x128x128xbf16>
    %141 = vector.shape_cast %140 : vector<1x128x128xbf16> to vector<128x128xbf16>
    %cst_56 = arith.constant dense<0.000000e+00> : vector<16x128xf32>
    %142 = tpu.matmul %139, %141, %cst_56 {dimension_numbers = #tpu.dot_dimension_numbers<[1], [0], [0], [1], [0, 0, 1, 1], [], []>} : vector<16x128xbf16>, vector<128x128xbf16>, vector<16x128xf32> -> vector<16x128xf32>
    %c0_57 = arith.constant 0 : index
    %c0_58 = arith.constant 0 : index
    %c0_59 = arith.constant 0 : index
    %143 = vector.load %arg15[%c0_57, %c0_58, %c0_59] : memref<1x1x128xf32, #tpu.memory_space<vmem>>, vector<1x1x128xf32>
    %144 = vector.shape_cast %143 : vector<1x1x128xf32> to vector<1x128xf32>
    %145 = vector.broadcast %144 : vector<1x128xf32> to vector<16x128xf32>
    %146 = arith.addf %142, %145 : vector<16x128xf32>
    %cst_60 = arith.constant 5.000000e-01 : f32
    %147 = vector.broadcast %cst_60 : f32 to vector<16x128xf32>
    %148 = arith.mulf %147, %146 : vector<16x128xf32>
    %cst_61 = arith.constant 4.471500e-02 : f32
    %149 = vector.broadcast %cst_61 : f32 to vector<16x128xf32>
    %150 = arith.mulf %149, %146 : vector<16x128xf32>
    %151 = arith.mulf %150, %146 : vector<16x128xf32>
    %152 = arith.mulf %151, %146 : vector<16x128xf32>
    %153 = arith.addf %146, %152 : vector<16x128xf32>
    %cst_62 = arith.constant 0.797884583 : f32
    %154 = vector.broadcast %cst_62 : f32 to vector<16x128xf32>
    %155 = arith.mulf %154, %153 : vector<16x128xf32>
    %156 = math.tanh %155 : vector<16x128xf32>
    %cst_63 = arith.constant 1.000000e+00 : f32
    %157 = vector.broadcast %cst_63 : f32 to vector<16x128xf32>
    %158 = arith.addf %157, %156 : vector<16x128xf32>
    %159 = arith.mulf %148, %158 : vector<16x128xf32>
    %160 = arith.truncf %159 : vector<16x128xf32> to vector<16x128xbf16>
    %c0_64 = arith.constant 0 : index
    %c0_65 = arith.constant 0 : index
    %c0_66 = arith.constant 0 : index
    %161 = vector.load %arg16[%c0_64, %c0_65, %c0_66] : memref<1x128x128xbf16, #tpu.memory_space<vmem>>, vector<1x128x128xbf16>
    %162 = vector.shape_cast %161 : vector<1x128x128xbf16> to vector<128x128xbf16>
    %cst_67 = arith.constant dense<0.000000e+00> : vector<16x128xf32>
    %163 = tpu.matmul %160, %162, %cst_67 {dimension_numbers = #tpu.dot_dimension_numbers<[1], [0], [0], [1], [0, 0, 1, 1], [], []>} : vector<16x128xbf16>, vector<128x128xbf16>, vector<16x128xf32> -> vector<16x128xf32>
    %c0_68 = arith.constant 0 : index
    %c0_69 = arith.constant 0 : index
    %c0_70 = arith.constant 0 : index
    %164 = vector.load %arg17[%c0_68, %c0_69, %c0_70] : memref<1x1x128xf32, #tpu.memory_space<vmem>>, vector<1x1x128xf32>
    %165 = vector.shape_cast %164 : vector<1x1x128xf32> to vector<1x128xf32>
    %166 = vector.broadcast %165 : vector<1x128xf32> to vector<16x128xf32>
    %167 = arith.addf %163, %166 : vector<16x128xf32>
    %168 = arith.addf %138, %167 : vector<16x128xf32>
    %c0_71 = arith.constant 0 : index
    %c0_72 = arith.constant 0 : index
    %c0_73 = arith.constant 0 : index
    %169 = vector.load %arg12[%c0_71, %c0_72, %c0_73] : memref<1x1x128xf32, #tpu.memory_space<vmem>>, vector<1x1x128xf32>
    %170 = vector.shape_cast %169 : vector<1x1x128xf32> to vector<1x128xf32>
    %c0_74 = arith.constant 0 : index
    %c0_75 = arith.constant 0 : index
    %c0_76 = arith.constant 0 : index
    %171 = vector.load %arg13[%c0_74, %c0_75, %c0_76] : memref<1x1x128xf32, #tpu.memory_space<vmem>>, vector<1x1x128xf32>
    %172 = vector.shape_cast %171 : vector<1x1x128xf32> to vector<1x128xf32>
    %cst_77 = arith.constant dense<0.000000e+00> : vector<16xf32>
    %173 = vector.multi_reduction <add>, %168, %cst_77 [1] : vector<16x128xf32> to vector<16xf32>
    %174 = vector.shape_cast %173 : vector<16xf32> to vector<16x1xf32>
    %cst_78 = arith.constant 1.280000e+02 : f32
    %175 = vector.broadcast %cst_78 : f32 to vector<16x1xf32>
    %176 = arith.divf %174, %175 : vector<16x1xf32>
    %177 = vector.broadcast %176 : vector<16x1xf32> to vector<16x128xf32>
    %178 = arith.subf %168, %177 : vector<16x128xf32>
    %179 = arith.mulf %178, %178 : vector<16x128xf32>
    %cst_79 = arith.constant dense<0.000000e+00> : vector<16xf32>
    %180 = vector.multi_reduction <add>, %179, %cst_79 [1] : vector<16x128xf32> to vector<16xf32>
    %181 = vector.shape_cast %180 : vector<16xf32> to vector<16x1xf32>
    %cst_80 = arith.constant 1.280000e+02 : f32
    %182 = vector.broadcast %cst_80 : f32 to vector<16x1xf32>
    %183 = arith.divf %181, %182 : vector<16x1xf32>
    %cst_81 = arith.constant 9.99999974E-6 : f32
    %184 = vector.broadcast %cst_81 : f32 to vector<16x1xf32>
    %185 = arith.addf %183, %184 : vector<16x1xf32>
    %186 = math.rsqrt %185 : vector<16x1xf32>
    %187 = vector.broadcast %186 : vector<16x1xf32> to vector<16x128xf32>
    %188 = arith.mulf %178, %187 : vector<16x128xf32>
    %189 = vector.broadcast %170 : vector<1x128xf32> to vector<16x128xf32>
    %190 = arith.mulf %188, %189 : vector<16x128xf32>
    %191 = vector.broadcast %172 : vector<1x128xf32> to vector<16x128xf32>
    %192 = arith.addf %190, %191 : vector<16x128xf32>
    %c0_82 = arith.constant 0 : index
    %c0_83 = arith.constant 0 : index
    %193 = vector.load %arg19[%c0_82, %c0_83] : memref<16x128xf32, #tpu.memory_space<vmem>>, vector<16x128xf32>
    tpu.vector_store %arg19[%c0_82, %c0_83], %192 {strides = array<i32>} : memref<16x128xf32, #tpu.memory_space<vmem>>, vector<16x128xf32>,
    %c1_i32 = arith.constant 1 : i32
    %194 = arith.cmpi eq, %arg1, %c1_i32 : i32
    %195 = arith.extui %194 : i1 to i32
    %c0_i32_84 = arith.constant 0 : i32
    %196 = arith.cmpi ne, %195, %c0_i32_84 : i32
    scf.if %196 {
      %197 = vector.shape_cast %192 : vector<16x128xf32> to vector<2x8x128xf32>
      %c0_85 = arith.constant 0 : index
      %c0_86 = arith.constant 0 : index
      %c0_87 = arith.constant 0 : index
      %198 = vector.load %arg18[%c0_85, %c0_86, %c0_87] : memref<2x8x128xf32, #tpu.memory_space<vmem>>, vector<2x8x128xf32>
      tpu.vector_store %arg18[%c0_85, %c0_86, %c0_87], %197 {strides = array<i32>} : memref<2x8x128xf32, #tpu.memory_space<vmem>>, vector<2x8x128xf32>,
    } else {
    }
    return
  }
  func.func @transform_0(%arg0: i32, %arg1: i32) -> (i32, i32, i32) {
    %c0_i32 = arith.constant 0 : i32
    %c0_i32_0 = arith.constant 0 : i32
    %c0_i32_1 = arith.constant 0 : i32
    return %arg0, %c0_i32, %c0_i32_0 : i32, i32, i32
  }
  func.func @transform_1(%arg0: i32, %arg1: i32) -> (i32, i32, i32) {
    %c0_i32 = arith.constant 0 : i32
    %c0_i32_0 = arith.constant 0 : i32
    %c0_i32_1 = arith.constant 0 : i32
    return %arg0, %c0_i32, %c0_i32_0 : i32, i32, i32
  }
  func.func @transform_2(%arg0: i32, %arg1: i32) -> (i32, i32) {
    %c0_i32 = arith.constant 0 : i32
    %c0_i32_0 = arith.constant 0 : i32
    %c0_i32_1 = arith.constant 0 : i32
    return %c0_i32, %c0_i32_0 : i32, i32
  }
  func.func @transform_3(%arg0: i32, %arg1: i32) -> (i32, i32) {
    %c0_i32 = arith.constant 0 : i32
    %c0_i32_0 = arith.constant 0 : i32
    %c0_i32_1 = arith.constant 0 : i32
    return %c0_i32, %c0_i32_0 : i32, i32
  }
  func.func @transform_4(%arg0: i32, %arg1: i32) -> (i32, i32, i32) {
    %c0_i32 = arith.constant 0 : i32
    %c0_i32_0 = arith.constant 0 : i32
    %c0_i32_1 = arith.constant 0 : i32
    return %arg1, %c0_i32, %c0_i32_0 : i32, i32, i32
  }
  func.func @transform_5(%arg0: i32, %arg1: i32) -> (i32, i32, i32) {
    %c0_i32 = arith.constant 0 : i32
    %c0_i32_0 = arith.constant 0 : i32
    %c0_i32_1 = arith.constant 0 : i32
    return %arg1, %c0_i32, %c0_i32_0 : i32, i32, i32
  }
  func.func @transform_6(%arg0: i32, %arg1: i32) -> (i32, i32, i32) {
    %c0_i32 = arith.constant 0 : i32
    %c0_i32_0 = arith.constant 0 : i32
    %c0_i32_1 = arith.constant 0 : i32
    return %arg1, %c0_i32, %c0_i32_0 : i32, i32, i32
  }
  func.func @transform_7(%arg0: i32, %arg1: i32) -> (i32, i32, i32) {
    %c0_i32 = arith.constant 0 : i32
    %c0_i32_0 = arith.constant 0 : i32
    %c0_i32_1 = arith.constant 0 : i32
    return %arg1, %c0_i32, %c0_i32_0 : i32, i32, i32
  }
  func.func @transform_8(%arg0: i32, %arg1: i32) -> (i32, i32, i32) {
    %c0_i32 = arith.constant 0 : i32
    %c0_i32_0 = arith.constant 0 : i32
    %c0_i32_1 = arith.constant 0 : i32
    return %arg1, %c0_i32, %c0_i32_0 : i32, i32, i32
  }
  func.func @transform_9(%arg0: i32, %arg1: i32) -> (i32, i32, i32) {
    %c0_i32 = arith.constant 0 : i32
    %c0_i32_0 = arith.constant 0 : i32
    %c0_i32_1 = arith.constant 0 : i32
    return %arg1, %c0_i32, %c0_i32_0 : i32, i32, i32
  }
  func.func @transform_10(%arg0: i32, %arg1: i32) -> (i32, i32, i32) {
    %c0_i32 = arith.constant 0 : i32
    %c0_i32_0 = arith.constant 0 : i32
    %c0_i32_1 = arith.constant 0 : i32
    return %arg1, %c0_i32, %c0_i32_0 : i32, i32, i32
  }
  func.func @transform_11(%arg0: i32, %arg1: i32) -> (i32, i32, i32) {
    %c0_i32 = arith.constant 0 : i32
    %c0_i32_0 = arith.constant 0 : i32
    %c0_i32_1 = arith.constant 0 : i32
    return %arg1, %c0_i32, %c0_i32_0 : i32, i32, i32
  }
  func.func @transform_12(%arg0: i32, %arg1: i32) -> (i32, i32, i32) {
    %c0_i32 = arith.constant 0 : i32
    %c0_i32_0 = arith.constant 0 : i32
    %c0_i32_1 = arith.constant 0 : i32
    return %arg1, %c0_i32, %c0_i32_0 : i32, i32, i32
  }
  func.func @transform_13(%arg0: i32, %arg1: i32) -> (i32, i32, i32) {
    %c0_i32 = arith.constant 0 : i32
    %c0_i32_0 = arith.constant 0 : i32
    %c0_i32_1 = arith.constant 0 : i32
    return %arg1, %c0_i32, %c0_i32_0 : i32, i32, i32
  }
  func.func @transform_14(%arg0: i32, %arg1: i32) -> (i32, i32, i32) {
    %c0_i32 = arith.constant 0 : i32
    %c0_i32_0 = arith.constant 0 : i32
    %c0_i32_1 = arith.constant 0 : i32
    return %arg1, %c0_i32, %c0_i32_0 : i32, i32, i32
  }
  func.func @transform_15(%arg0: i32, %arg1: i32) -> (i32, i32, i32) {
    %c0_i32 = arith.constant 0 : i32
    %c0_i32_0 = arith.constant 0 : i32
    %c0_i32_1 = arith.constant 0 : i32
    return %arg1, %c0_i32, %c0_i32_0 : i32, i32, i32
  }
  func.func @transform_16(%arg0: i32, %arg1: i32) -> (i32, i32, i32) {
    %c0_i32 = arith.constant 0 : i32
    %c0_i32_0 = arith.constant 0 : i32
    %c0_i32_1 = arith.constant 0 : i32
    return %arg0, %c0_i32, %c0_i32_0 : i32, i32, i32
  }
}

</mosaic_0001>

<bundles_post_ra>
// kernel: tpu_custom_call.1
= control target key start
LH: loop header
LB: loop body
LE: loop exit
PB: predicated region body
PF: predicated region fallthrough
CT: control target
= control target key end

     0   :  { %s4551_s0 = inlined_call_operand.hbm [shape: bf16[2,8,16], index: 0, kind: input, shape index: {}]   ;;  %s4552_s1 = inlined_call_operand.vmem [shape: f32[2,1,8], index: 1, kind: input, shape index: {}]   ;;  %s4553_s2 = inlined_call_operand.hbm [shape: bf16[16,128], index: 2, kind: input, shape index: {}]   ;;  %s4554_s3 = inlined_call_operand.hbm [shape: f32[1,128], index: 3, kind: input, shape index: {}]   ;;  %s4555_s4 = inlined_call_operand.hbm [shape: bf16[2,128,384], index: 4, kind: input, shape index: {}]   ;;  %s4556_s5 = inlined_call_operand.vmem [shape: f32[2,1,384], index: 5, kind: input, shape index: {}]   ;;  %s4557_s6 = inlined_call_operand.hbm [shape: bf16[2,128,128], index: 6, kind: input, shape index: {}]   ;;  %s4558_s7 = inlined_call_operand.vmem [shape: f32[2,1,128], index: 7, kind: input, shape index: {}]   ;;  %s4559_s8 = inlined_call_operand.vmem [shape: f32[2,1,128], index: 8, kind: input, shape index: {}]   ;;  %s4560_s9 = inlined_call_operand.vmem [shape: f32[2,1,128], index: 9, kind: input, shape index: {}]   ;;  %s4561_s10 = inlined_call_operand.vmem [shape: f32[2,1,128], index: 10, kind: input, shape index: {}]   ;;  %s4562_s11 = inlined_call_operand.vmem [shape: f32[2,1,128], index: 11, kind: input, shape index: {}]   ;;  %s4563_s12 = inlined_call_operand.hbm [shape: bf16[2,128,128], index: 12, kind: input, shape index: {}]   ;;  %s4564_s13 = inlined_call_operand.vmem [shape: f32[2,1,128], index: 13, kind: input, shape index: {}]   ;;  %s4565_s14 = inlined_call_operand.hbm [shape: bf16[2,128,128], index: 14, kind: input, shape index: {}]   ;;  %s4566_s15 = inlined_call_operand.vmem [shape: f32[2,1,128], index: 15, kind: input, shape index: {}]   ;;  %s4567_s16 = inlined_call_operand.hbm [shape: f32[2,8,128], index: 16, kind: output, shape index: {}]  }
   0x1   :  { %4590 = sst [smem:[#allocation27_spill]] %s4551_s0 }
   0x2   :  { %4591 = sst [smem:[#allocation28_spill]] %s4552_s1 }
   0x3   :  { %4592 = sst [smem:[#allocation29_spill]] %s4553_s2 }
   0x4   :  { %4593 = sst [smem:[#allocation30_spill]] %s4554_s3 }
   0x5   :  { %4594 = sst [smem:[#allocation31_spill]] %s4555_s4 }
   0x6   :  { %4595 = sst [smem:[#allocation32_spill]] %s4556_s5 }
   0x7   :  { %4596 = sst [smem:[#allocation33_spill]] %s4557_s6 }
   0x8   :  { %4597 = sst [smem:[#allocation34_spill]] %s4558_s7 }
   0x9   :  { %4598 = sst [smem:[#allocation35_spill]] %s4559_s8 }
   0xa   :  { %4599 = sst [smem:[#allocation36_spill]] %s4560_s9 }
   0xb   :  { %4600 = sst [smem:[#allocation37_spill]] %s4561_s10 }
   0xc   :  { %4601 = sst [smem:[#allocation38_spill]] %s4562_s11 }
   0xd   :  { %4602 = sst [smem:[#allocation39_spill]] %s4563_s12 }
   0xe   :  { %4603 = sst [smem:[#allocation40_spill]] %s4564_s13 }
   0xf   :  { %4604 = sst [smem:[#allocation41_spill]] %s4566_s15 }
  0x10   :  { %4605 = sst [smem:[#allocation42_spill]] %s4567_s16 }
  0x11   :  { %21 = vsyncpa [#allocation5], 0 }
  0x12   :  { %22 = vsyncpa [#allocation8], 0 }
  0x13   :  { %23 = vsyncpa [#allocation11], 0 }
  0x14   :  { %25 = vsyncpa [#allocation11 + $0x1], 0 }
  0x15   :  { %26 = vsyncpa [#allocation14], 0 }
  0x16   :  { %28 = vsyncpa [#allocation14 + $0x1], 0 }
  0x17   :  { %29 = vsyncpa [#allocation6], 0  ;;  %s3824_s21 = smov 0   ;;  %s3826_s22 = smov 0  }
  0x18   :  { %s3828_s23 = smov 0   ;;  %s3830_s24 = smov 0  }
  0x19   :  { %s3832_s25 = smov 0   ;;  %s3834_s26 = smov 0  }
  0x1a LB: > { %4606 = sst [smem:[#allocation22_spill]] %s3703_s23  ;;  %s3853_s27 = sadd.s32 4294967295, %s3715_s26   ;;  %s3715_s26 = sphi %s3834_s26, %s35_s26   ;;  %s3711_s25 = sphi %s3832_s25, %s4660_s25   ;;  %s3707_s24 = sphi %s3830_s24, %s4659_s24   ;;  %s3703_s23 = sphi %s3828_s23, %s4658_s23   ;;  %s3699_s22 = sphi %s3826_s22, %s4662_s22   ;;  %s3695_s21 = sphi %s3824_s21, %s4661_s21  }
  0x1b   : > { %4607 = sst [smem:[#allocation23_spill]] %s3711_s25  ;;  %p161_p0 = scmp.ne.s32.totalorder %s3699_s22, %s3695_s21 }
  0x1c   : > { %4608 = sst [smem:[#allocation24_spill]] %s3715_s26  ;;  %p4571_p1 = scmp.eq.s32.totalorder %s3853_s27, 0 }
  0x1d   : > { %p2818_p2 = scmp.ge.s32.totalorder %s3715_s26, 1  ;;  %p484_p3 = scmp.lt.s32.totalorder %s3715_s26, 3 }
  0x1e   : > { %p3861_p4 = por %p4571_p1, %p161_p0  ;;  %s3717_s30 = smov [#allocation7]  }
  0x1f   : > { %p3865_p5 = pnand %p2818_p2, %p484_p3  ;;  %s520_s0 = sshll.u32 %s3717_s30, 4  ;;  %s521_s0 = int_to_ptr.vmem [resolvable:$true] %s520_s0 }
  0x20   : > { %s4609_s28 = scalar_select %p3861_p4, 1, 0 }
  0x21   : > { %s4610_s29 = scalar_select %p3865_p5, 1, 0 }
  0x22   : > { %p3219_p6 = pneg %p3865_p5  ;;  %s44_s18 = sadd.s32 1, %s3711_s25 }
  0x23   : > { %s4612_s2 = sld [smem:[#allocation29_spill]] }
  0x24   : > { %p3873_p7 = pnand %p3219_p6, %p4571_p1 }
  0x26   : > { %s4611_s17 = scalar_select %p3873_p7, 1, 0 }
  0x27   : > { %p3886_p9 = pneg %p3873_p7 }
  0x29   : > { %s3419_s21 = scalar_lea.hbm %s4612_s2, 128 }
  0x2a   : > { %p3420_p8 = scmp.ne.s32.totalorder %s4612_s2, %s3419_s21  ;;  %p3426_p12 = scmp.lt.u32.totalorder %s3419_s21, %s4612_s2 }
  0x2b   : > { %s4613_s15 = scalar_select %p3886_p9, 1, 0 }
  0x2c   : > { %p3422_p10 = pnand %p3886_p9, %p3420_p8 }
  0x2e   : > { %p3423_p11 = pneg %p3422_p10 }
  0x30   : > { %p3428_p13 = pnand %p3426_p12, %p3423_p11 }
  0x32   : > { %3431 = shalt.err (!%p3428_p13)
}
  0x33   : > { %s3432_s19 = scalar_lea.vmem %s521_s0, 128  ;;  %p3440_p6 = scmp.lt.s32.totalorder %s521_s0, %s521_s0 }
  0x34   : > { %p3433_p0 = scmp.ne.s32.totalorder %s521_s0, %s3432_s19  ;;  %p3441_p1 = scmp.lt.s32.totalorder %s3432_s19, %s3432_s19 }
  0x36   : > { %p3435_p2 = pnand %p3433_p0, %p3886_p9  ;;  %p3442_p4 = por %p3441_p1, %p3440_p6 }
  0x38   : > { %p3436_p3 = pneg %p3435_p2 }
  0x3a   : > { %p3443_p5 = pnand %p3442_p4, %p3436_p3 }
  0x3c   : > { %3446 = shalt.err (!%p3443_p5)
}
  0x3d   : > { %s4574_s1 = smov 64   ;;  %s4576_s13 = smov 4  }
  0x3e   : > { %3225 = dma.hbm_to_vmem [thread:$0]  (!%p3873_p7), %s4612_s2, 128, %s521_s0, [#allocation8], %s4574_s1, %s4574_s1, %s4576_s13  }
  0x3f   : > { %p45_p1 = scmp.ge.s32.totalorder %s44_s18, 2  ;;  %s148_s21 = sadd.s32 1, %s3703_s23 }
  0x40   : > { %p155_p4 = scmp.ne.s32.totalorder %s3703_s23, %s3699_s22  ;;  %p156_p5 = scmp.eq.s32.totalorder %s3715_s26, 0 }
  0x41   : > { %s4664_s18 = smov (%p45_p1, %s44_s18), 0  ;;  %p3245_p10 = scmp.lt.s32.totalorder %s3715_s26, 2 }
  0x42   : > { %4614 = sst [smem:[#allocation25_spill]] %s4664_s18  ;;  %p157_p8 = por %p156_p5, %p155_p4 }
  0x43   : > { %s145_s30 = ssub.s32 %s3711_s25, %s4664_s18  ;;  %s4579_s19 = sand.u32 1, %s3715_s26  }
  0x44   : > { %p146_p11 = scmp.eq.s32.totalorder %s145_s30, 0  ;;  %s547_s11 = sand.u32 1, %s3703_s23  }
  0x45   : > { %s3192_s10 = smul.u32 3072, %s3711_s25  ;;  %s4616_s4 = sld [smem:[#allocation31_spill]] }
  0x46   : > { %s3918_s5 = scalar_select %p146_p11, %s3703_s23, %s148_s21  }
  0x47   : > { %s3191_s9 = smul.u32 192, %s547_s11  ;;  %p3925_p12 = pnand %p3245_p10, %p157_p8 }
  0x48   : > { %4615 = sst [smem:[#allocation26_spill]] %s3918_s5  ;;  %s3931_s21 = sshll.u32 %s547_s11, 6 }
  0x49   : > { %s4617_s1 = scalar_select %p3925_p12, 1, 0 }
  0x4a   : > { %s549_s30 = scalar_lea.vmem [#allocation10], %s3191_s9  ;;  %s3935_s2 = scalar_lea.sflag [#allocation11], %s4579_s19 }
  0x4b   : > { %s3923_s20 = scalar_lea.hbm %s4616_s4, %s3192_s10  ;;  %s556_s13 = sshll.u32 %s549_s30, 4  ;;  %s3929_s13 = int_to_ptr.vmem [resolvable:$true] %s556_s13 }
  0x4c   : > { %s3447_s10 = scalar_lea.hbm %s3923_s20, 3072  ;;  %p3941_p0 = pneg %p3925_p12 }
  0x4d   : > { %p3448_p13 = scmp.ne.s32.totalorder %s3923_s20, %s3447_s10  ;;  %s3452_s30 = scalar_lea.hbm %s4616_s4, 6144 }
  0x4e   : > { %p3453_p6 = scmp.lt.u32.totalorder %s3923_s20, %s4616_s4  ;;  %p3454_p1 = scmp.lt.u32.totalorder %s3452_s30, %s3447_s10 }
  0x4f   : > { %p3450_p2 = pnand %p3941_p0, %p3448_p13  ;;  %p3456_p5 = scmp.lt.u32.totalorder %s3447_s10, %s3923_s20 }
  0x50   : > { %p3455_p4 = por %p3454_p1, %p3453_p6 }
  0x51   : > { %p3451_p3 = pneg %p3450_p2 }
  0x52   : > { %p3457_p8 = por %p3456_p5, %p3455_p4 }
  0x54   : > { %p3458_p10 = pnand %p3457_p8, %p3451_p3 }
  0x56   : > { %3461 = shalt.err (!%p3458_p10)
}
  0x57   : > { %s3462_s19 = scalar_lea.vmem %s3929_s13, 3072  ;;  %s3720_s9 = smov [#allocation10]  }
  0x58   : > { %p3463_p11 = scmp.ne.s32.totalorder %s3929_s13, %s3462_s19  ;;  %s3467_s0 = sshll.u32 %s3720_s9, 4  ;;  %s3468_s0 = int_to_ptr.vmem [resolvable:$false] %s3467_s0 }
  0x59   : > { %s3469_s18 = scalar_lea.vmem %s3468_s0, 6144  ;;  %p3470_p7 = scmp.lt.s32.totalorder %s3929_s13, %s3468_s0 }
  0x5a   : > { %p3465_p13 = pnand %p3463_p11, %p3941_p0  ;;  %p3471_p9 = scmp.lt.s32.totalorder %s3469_s18, %s3462_s19 }
  0x5c   : > { %p3466_p2 = pneg %p3465_p13  ;;  %p3472_p6 = por %p3471_p9, %p3470_p7 }
  0x5e   : > { %p3473_p1 = pnand %p3472_p6, %p3466_p2 }
  0x60   : > { %3476 = shalt.err (!%p3473_p1)
}
  0x61   : > { %s3721_s10 = smov 192   ;;  %s3722_s30 = smov 12  }
  0x62   : > { %3232 = dma.hbm_to_vmem [thread:$0]  (!%p3925_p12), %s3923_s20, 3072, %s3929_s13, %s3935_s2, %s3721_s10, %s3721_s10, %s3722_s30  }
  0x63   : > { %s3966_s11 = sshll.u32 %s3711_s25, 10  ;;  %s4619_s12 = sld [smem:[#allocation39_spill]] }
  0x64   : > { %s628_s18 = scalar_lea.vmem [#allocation13], %s3931_s21  ;;  %s4620_s5 = sand.u32 1, %s3715_s26  }
  0x65   : > { %s635_s4 = sshll.u32 %s628_s18, 4  ;;  %s3979_s23 = scalar_lea.sflag [#allocation14], %s4620_s5  ;;  %s3975_s4 = int_to_ptr.vmem [resolvable:$true] %s635_s4 }
  0x69   : > { %s3972_s0 = scalar_lea.hbm %s4619_s12, %s3966_s11  ;;  %s3482_s30 = scalar_lea.hbm %s4619_s12, 2048 }
  0x6a   : > { %s3477_s13 = scalar_lea.hbm %s3972_s0, 1024  ;;  %p3483_p4 = scmp.lt.u32.totalorder %s3972_s0, %s4619_s12 }
  0x6b   : > { %p3478_p7 = scmp.ne.s32.totalorder %s3972_s0, %s3477_s13  ;;  %p3484_p5 = scmp.lt.u32.totalorder %s3482_s30, %s3477_s13 }
  0x6c   : > { %p3486_p10 = scmp.lt.u32.totalorder %s3477_s13, %s3972_s0 }
  0x6d   : > { %p3480_p9 = pnand %p3478_p7, %p3941_p0  ;;  %p3485_p8 = por %p3484_p5, %p3483_p4 }
  0x6f   : > { %p3481_p3 = pneg %p3480_p9  ;;  %p3487_p11 = por %p3486_p10, %p3485_p8 }
  0x71   : > { %p3488_p13 = pnand %p3487_p11, %p3481_p3 }
  0x73   : > { %3491 = shalt.err (!%p3488_p13)
}
  0x74   : > { %s3492_s5 = scalar_lea.vmem %s3975_s4, 1024  ;;  %s3723_s18 = smov [#allocation13]  }
  0x75   : > { %p3493_p2 = scmp.ne.s32.totalorder %s3975_s4, %s3492_s5  ;;  %s3497_s20 = sshll.u32 %s3723_s18, 4  ;;  %s3498_s20 = int_to_ptr.vmem [resolvable:$false] %s3497_s20 }
  0x76   : > { %s3499_s10 = scalar_lea.vmem %s3498_s20, 2048  ;;  %p3500_p7 = scmp.lt.s32.totalorder %s3975_s4, %s3498_s20 }
  0x77   : > { %p3495_p6 = pnand %p3493_p2, %p3941_p0  ;;  %p3501_p9 = scmp.lt.s32.totalorder %s3499_s10, %s3492_s5 }
  0x79   : > { %p3496_p1 = pneg %p3495_p6  ;;  %p3502_p4 = por %p3501_p9, %p3500_p7 }
  0x7b   : > { %p3503_p5 = pnand %p3502_p4, %p3496_p1 }
  0x7d   : > { %3506 = shalt.err (!%p3503_p5)
}
  0x7e   : > { %s4621_s13 = smov 4   ;;  %s4622_s30 = smov 64  }
  0x7f   : > { %3238 = dma.hbm_to_vmem [thread:$0]  (!%p3925_p12), %s3972_s0, 1024, %s3975_s4, %s3979_s23, %s4622_s30, %s4622_s30, %s4621_s13  }
  0x80   : > { %s3724_s9 = smov [#allocation4]   ;;  %s3725_s18 = smov [#allocation9]  }
  0x81   : > { %s499_s19 = sshll.u32 %s3724_s9, 4  ;;  %s534_s12 = sshll.u32 %s3725_s18, 4  ;;  %s500_s19 = int_to_ptr.vmem [resolvable:$true] %s499_s19  ;;  %s4006_s12 = int_to_ptr.vmem [resolvable:$true] %s534_s12 }
  0x82   : > { %s4623_s10 = sld [smem:[#allocation27_spill]]  ;;  %p4624_p8 = scmp.ne.s32.totalorder %s4613_s15, 0 }
  0x88   : > { %s3507_s25 = scalar_lea.hbm %s4623_s10, 128 }
  0x89   : > { %p3508_p3 = scmp.ne.s32.totalorder %s4623_s10, %s3507_s25  ;;  %p3514_p13 = scmp.lt.u32.totalorder %s3507_s25, %s4623_s10 }
  0x8b   : > { %p3510_p10 = pnand %p3508_p3, %p4624_p8 }
  0x8d   : > { %p3511_p11 = pneg %p3510_p10 }
  0x8f   : > { %p3516_p2 = pnand %p3514_p13, %p3511_p11 }
  0x91   : > { %3519 = shalt.err (!%p3516_p2)
}
  0x92   : > { %s3520_s0 = scalar_lea.vmem %s500_s19, 128  ;;  %p3528_p9 = scmp.lt.s32.totalorder %s500_s19, %s500_s19 }
  0x93   : > { %p3521_p6 = scmp.ne.s32.totalorder %s500_s19, %s3520_s0  ;;  %p3529_p4 = scmp.lt.s32.totalorder %s3520_s0, %s3520_s0 }
  0x95   : > { %p3523_p1 = pnand %p3521_p6, %p4624_p8  ;;  %p3530_p5 = por %p3529_p4, %p3528_p9 }
  0x97   : > { %p3524_p7 = pneg %p3523_p1 }
  0x99   : > { %p3531_p12 = pnand %p3530_p5, %p3524_p7 }
  0x9b   : > { %3534 = shalt.err (!%p3531_p12)
}
  0x9c   : > { %p4625_p3 = scmp.ne.s32.totalorder %s4611_s17, 0  ;;  %s4626_s3 = sld [smem:[#allocation30_spill]] }
  0x9e   : > { %3222 = dma.hbm_to_vmem [thread:$0]  (!%p4625_p3), %s4623_s10, 128, %s500_s19, [#allocation5], %s4622_s30, %s4622_s30, %s4621_s13  }
  0xa2   : > { %s3535_s9 = scalar_lea.hbm %s4626_s3, 16 }
  0xa3   : > { %p3536_p10 = scmp.ne.s32.totalorder %s4626_s3, %s3535_s9  ;;  %p3542_p13 = scmp.lt.u32.totalorder %s3535_s9, %s4626_s3 }
  0xa5   : > { %p3538_p12 = pnand %p3536_p10, %p4624_p8 }
  0xa7   : > { %p3539_p11 = pneg %p3538_p12 }
  0xa9   : > { %p3544_p2 = pnand %p3542_p13, %p3539_p11 }
  0xab   : > { %3547 = shalt.err (!%p3544_p2)
}
  0xac   : > { %s3548_s19 = scalar_lea.vmem %s4006_s12, 16  ;;  %s3555_s0 = scalar_lea.vmem %s4006_s12, 32 }
  0xad   : > { %p3549_p6 = scmp.ne.s32.totalorder %s4006_s12, %s3548_s19  ;;  %p3556_p9 = scmp.lt.s32.totalorder %s4006_s12, %s4006_s12 }
  0xae   : > { %p3557_p4 = scmp.lt.s32.totalorder %s3555_s0, %s3548_s19 }
  0xaf   : > { %p3551_p1 = pnand %p3549_p6, %p4624_p8 }
  0xb0   : > { %p3558_p5 = por %p3557_p4, %p3556_p9 }
  0xb1   : > { %p3552_p7 = pneg %p3551_p1 }
  0xb3   : > { %p3559_p10 = pnand %p3558_p5, %p3552_p7 }
  0xb5   : > { %3562 = shalt.err (!%p3559_p10)
}
  0xb6   : > { %3228 = dma.hbm_to_vmem [thread:$0]  (!%p4625_p3), %s4626_s3, 16, %s4006_s12, [#allocation8]  }
  0xb7   : > { %s4627_s6 = sld [smem:[#allocation33_spill]]  ;;  %s577_s9 = scalar_lea.vmem [#allocation12], %s3931_s21 }
  0xb8   : > { %s584_s17 = sshll.u32 %s577_s9, 4  ;;  %s4066_s20 = scalar_lea.hbm %s4565_s14, %s3966_s11  ;;  %s4060_s17 = int_to_ptr.vmem [resolvable:$true] %s584_s17 }
  0xbd   : > { %s4057_s26 = scalar_lea.hbm %s4627_s6, %s3966_s11  ;;  %s3568_s0 = scalar_lea.hbm %s4627_s6, 2048 }
  0xbe   : > { %s3563_s4 = scalar_lea.hbm %s4057_s26, 1024  ;;  %p3569_p11 = scmp.lt.u32.totalorder %s4057_s26, %s4627_s6 }
  0xbf   : > { %p3564_p8 = scmp.ne.s32.totalorder %s4057_s26, %s3563_s4  ;;  %p3570_p13 = scmp.lt.u32.totalorder %s3568_s0, %s3563_s4 }
  0xc0   : > { %p3572_p6 = scmp.lt.u32.totalorder %s3563_s4, %s4057_s26 }
  0xc1   : > { %p3566_p3 = pnand %p3564_p8, %p3941_p0  ;;  %p3571_p2 = por %p3570_p13, %p3569_p11 }
  0xc3   : > { %p3567_p12 = pneg %p3566_p3  ;;  %p3573_p1 = por %p3572_p6, %p3571_p2 }
  0xc5   : > { %p3574_p7 = pnand %p3573_p1, %p3567_p12 }
  0xc7   : > { %3577 = shalt.err (!%p3574_p7)
}
  0xc8   : > { %s3578_s11 = scalar_lea.vmem %s4060_s17, 1024  ;;  %s3726_s15 = smov [#allocation12]  }
  0xc9   : > { %p3579_p9 = scmp.ne.s32.totalorder %s4060_s17, %s3578_s11  ;;  %s3583_s25 = sshll.u32 %s3726_s15, 4  ;;  %s3584_s25 = int_to_ptr.vmem [resolvable:$false] %s3583_s25 }
  0xca   : > { %s3585_s9 = scalar_lea.vmem %s3584_s25, 2048  ;;  %p3586_p10 = scmp.lt.s32.totalorder %s4060_s17, %s3584_s25 }
  0xcb   : > { %p3581_p4 = pnand %p3579_p9, %p3941_p0  ;;  %p3587_p8 = scmp.lt.s32.totalorder %s3585_s9, %s3578_s11 }
  0xcd   : > { %p3582_p5 = pneg %p3581_p4  ;;  %p3588_p3 = por %p3587_p8, %p3586_p10 }
  0xcf   : > { %p3589_p11 = pnand %p3588_p3, %p3582_p5 }
  0xd1   : > { %3592 = shalt.err (!%p3589_p11)
}
  0xd2   : > { %p4628_p12 = scmp.ne.s32.totalorder %s4617_s1, 0  ;;  %s655_s18 = scalar_lea.vmem [#allocation15], %s3931_s21 }
  0xd3   : > { %s662_s5 = sshll.u32 %s655_s18, 4  ;;  %s3593_s4 = scalar_lea.hbm %s4066_s20, 1024  ;;  %s4094_s5 = int_to_ptr.vmem [resolvable:$true] %s662_s5 }
  0xd4   : > { %3235 = dma.hbm_to_vmem [thread:$0]  (!%p4628_p12), %s4057_s26, 1024, %s4060_s17, %s3935_s2, %s4622_s30, %s4622_s30, %s4621_s13  }
  0xd5   : > { %p3594_p13 = scmp.ne.s32.totalorder %s4066_s20, %s3593_s4  ;;  %s3598_s0 = scalar_lea.hbm %s4565_s14, 2048 }
  0xd6   : > { %p3599_p1 = scmp.lt.u32.totalorder %s4066_s20, %s4565_s14  ;;  %p3600_p7 = scmp.lt.u32.totalorder %s3598_s0, %s3593_s4 }
  0xd7   : > { %p3596_p2 = pnand %p3594_p13, %p3941_p0  ;;  %p3602_p4 = scmp.lt.u32.totalorder %s3593_s4, %s4066_s20 }
  0xd8   : > { %p3601_p9 = por %p3600_p7, %p3599_p1 }
  0xd9   : > { %p3597_p6 = pneg %p3596_p2 }
  0xda   : > { %p3603_p5 = por %p3602_p4, %p3601_p9 }
  0xdc   : > { %p3604_p10 = pnand %p3603_p5, %p3597_p6 }
  0xde   : > { %3607 = shalt.err (!%p3604_p10)
}
  0xdf   : > { %s3608_s2 = scalar_lea.vmem %s4094_s5, 1024  ;;  %s3727_s21 = smov [#allocation15]  }
  0xe0   : > { %p3609_p8 = scmp.ne.s32.totalorder %s4094_s5, %s3608_s2  ;;  %s3613_s26 = sshll.u32 %s3727_s21, 4  ;;  %s3614_s26 = int_to_ptr.vmem [resolvable:$false] %s3613_s26 }
  0xe1   : > { %s3615_s17 = scalar_lea.vmem %s3614_s26, 2048  ;;  %p3616_p13 = scmp.lt.s32.totalorder %s4094_s5, %s3614_s26 }
  0xe2   : > { %p3611_p3 = pnand %p3609_p8, %p3941_p0  ;;  %p3617_p2 = scmp.lt.s32.totalorder %s3615_s17, %s3608_s2 }
  0xe4   : > { %p3612_p11 = pneg %p3611_p3  ;;  %p3618_p1 = por %p3617_p2, %p3616_p13 }
  0xe6   : > { %p3619_p7 = pnand %p3618_p1, %p3612_p11 }
  0xe8   : > { %3622 = shalt.err (!%p3619_p7)
}
  0xe9   : > { %3241 = dma.hbm_to_vmem [thread:$0]  (!%p4628_p12), %s4066_s20, 1024, %s4094_s5, %s3979_s23, %s4622_s30, %s4622_s30, %s4621_s13  }
  0xea   : > { %p4629_p0 = scmp.ne.s32.totalorder %s4610_s29, 0 }
  0xeb   : > { %p4630_p6 = scmp.eq.s32.totalorder (!%p4629_p0), %s3853_s27, 0 }
  0xec   : > { %680 = sbr.rel (%p4629_p0) target bundleno = 4618 (0x120a), region = 84 }
  0xf3   : > { %3674 = dma.done.wait (%p4630_p6), [#allocation5], 128   ;;  %p4631_p9 = pmov %p4630_p6 }
  0xf4   : > { %p4632_p4 = pmov %p4630_p6 }
  0xf5   : > { %3676 = vsyncadd (%p4631_p9), [#allocation5], 4294967168 }
  0xf6   : > { %3678 = dma.done.wait (%p4632_p4), [#allocation8], 144   ;;  %p4633_p5 = pmov %p4632_p4 }
  0xf7   : > { %s694_s1 = sand.u32 1, %s3853_s27   ;;  %s696_s23 = sand.u32 1, %s3699_s22  }
  0xf8   : > { %3680 = vsyncadd (%p4633_p5), [#allocation8], 4294967152  ;;  %s3193_s16 = smul.u32 192, %s696_s23  ;;  %s695_s29 = scalar_lea.sflag [#allocation11], %s694_s1 }
  0xf9   : > { %p4634_p12 = scmp.ne.s32.totalorder %s4609_s28, 0 }
  0xfa   : > { %s4133_s13 = scalar_lea.vmem [#allocation10], %s3193_s16 }
  0xfb   : > { %3682 = dma.done.wait (%p4634_p12), %s695_s29, 4096  }
  0xfc   : > { %3684 = vsyncadd (%p4634_p12), %s695_s29, 4294963200  ;;  %s2838_s30 = sshll.u32 %s696_s23, 6  ;;  %s713_s11 = scalar_lea.sflag [#allocation14], %s694_s1 }
  0xfd   : > { %s4139_s20 = scalar_lea.vmem [#allocation12], %s2838_s30  ;;  %s4141_s15 = scalar_lea.vmem [#allocation13], %s2838_s30 }
  0xfe   : > { %3686 = dma.done.wait (%p4634_p12), %s713_s11, 2048  }
  0xff   : > { %3688 = vsyncadd (%p4634_p12), %s713_s11, 4294965248  ;;  %p819_p10 = scmp.lt.s32.totalorder %s3707_s24, 1  ;;  %s4638_s23 = sld [smem:[#allocation32_spill]] }
 0x100   : > { %s4639_s3 = sld [smem:[#allocation37_spill]]  ;;  %s4640_s5 = sld [smem:[#allocation38_spill]] }
 0x101   : > { %s4149_s25 = scalar_select %p819_p10, %s3707_s24, 1 }
 0x102   : > { %s4641_s19 = sld [smem:[#allocation40_spill]]  ;;  %s4642_s2 = sld [smem:[#allocation41_spill]] }
 0x103   : > { %s3194_s9 = smul.u32 3, %s4149_s25  ;;  %s4185_s26 = scalar_lea.vmem [#allocation15], %s2838_s30 }
 0x104   : > { %p2841_p8 = scmp.ne.s32.totalorder %s3707_s24, 0 }
 0x105   : > { %s4167_s16 = scalar_lea.vmem %s4638_s23, %s3194_s9  ;;  %v3317_v0 = vld [vmem:[#allocation7] sm:$0xff] (!%p2841_p8)   ;;  %v3728_v1 = vmov (!%p2841_p8), 0.0   ;;  %v3318_v2 = vld [vmem:[#allocation4] sm:$0xff] (!%p2841_p8)   ;;  %vm3729_vm0 = vmmov (!%p2841_p8), 0   ;;  %vm872_vm1 = vcmask (!%p2841_p8), 130048  }
 0x106   : > { %s834_s6 = scalar_lea.vmem %s4639_s3, %s4149_s25  ;;  %s837_s4 = scalar_lea.vmem %s4640_s5, %s4149_s25  ;;  %3009 = vmatprep.subr.bf16.mxu0 (!%p2841_p8), %v3728_v1  ;;  %3011 = vmatprep.mubr.msk.bf16.mxu0 (!%p2841_p8), %vm3729_vm0, %v3728_v1  ;;  %v2842_v3 = vld [vmem:[#allocation9] ss:$0 sm:$0xff] (!%p2841_p8) }
 0x107   : > { %849 = sbr.rel (%p2841_p8) target bundleno = 483 (0x1e3), region = 116  ;;  %3010 = vmatpush3.bf16.msra.mxu0 (!%p2841_p8), %v3317_v0 }
 0x108   : > { %s840_s0 = scalar_lea.vmem %s4641_s19, %s4149_s25  ;;  %s843_s21 = scalar_lea.vmem %s4642_s2, %s4149_s25 }
 0x10a   : > { %3012 = vmatmul.mubr.msk.bf16.vlgmr.msra.gmra.mrb[0].mxu0 (!%p2841_p8), %vm872_vm1, %v3318_v2 }
 0x1dd   : > { %v910_v4 = vpop.f32.mrb[0].mxu0 }
 0x1de   : > { %v911_v5 = vadd.f32 %v2842_v3, %v910_v4  ;;  %v3013_v6 = vpop.f32.mrb[1].mxu0 }
 0x1df   : > { %v913_v7 = vpop.f32.mrb[2].mxu0 }
 0x1e0   : > { %917 = vst [vmem:[#allocation2] sm:$0xff] %v911_v5  ;;  %v914_v8 = vadd.f32 %v2842_v3, %v913_v7  ;;  %v3014_v9 = vpop.f32.mrb[3].mxu0 }
 0x1e2   : > { %918 = vst [vmem:[#allocation2 + $0x8] sm:$0xff] %v914_v8 }
 0x1e3 PF: > { %v3319_v10 = vld [vmem:[%s4133_s13 + $0x4] ss:$12 sps:$4 sm:$0xff]   ;;  %v3321_v11 = vld [vmem:[%s4133_s13] ss:$12 sps:$4 sm:$0xff]   ;;  %v3730_v12 = vmov 0   ;;  %v3731_v13 = vmov 0.0   ;;  %v956_v39 = vlaneseq }
 0x1e4   : > { %1131 = vmatprep.mubr.bf16.mxu0 %v3730_v12  ;;  %3015 = vmatprep.subr.bf16.mxu1 %v3731_v13  ;;  %v3322_v14 = vld [vmem:[%s4133_s13 + $0x1c] ss:$12 sps:$4 sm:$0xff]   ;;  %v3324_v15 = vld [vmem:[%s4133_s13 + $0x18] ss:$12 sps:$4 sm:$0xff]   ;;  %v3325_v16 = vld [vmem:[%s4133_s13 + $0x34] ss:$12 sps:$4 sm:$0xff]  }
 0x1e5   : > { %1099 = vmatprep.subr.bf16.mxu0 %v3319_v10  ;;  %v3327_v17 = vld [vmem:[%s4133_s13 + $0x30] ss:$12 sps:$4 sm:$0xff]   ;;  %v3328_v18 = vld [vmem:[%s4133_s13 + $0x4c] ss:$12 sps:$4 sm:$0xff]   ;;  %v3330_v19 = vld [vmem:[%s4133_s13 + $0x48] ss:$12 sps:$4 sm:$0xff]  }
 0x1e6   : > { %1100 = vmatpush1.bf16.msra.mxu0 %v3321_v11  ;;  %v3331_v20 = vld [vmem:[%s4133_s13 + $0x64] ss:$12 sps:$4 sm:$0xff]   ;;  %v3343_v21 = vld [vmem:[%s4133_s13 + $0x8] ss:$12 sps:$4 sm:$0xff]   ;;  %v3344_v22 = vld [vmem:[%s4133_s13 + $0x20] ss:$12 sps:$4 sm:$0xff]  }
 0x1e7   : > { %1101 = vmatprep.subr.bf16.mxu0 %v3322_v14  ;;  %3016 = vmatpush3.bf16.msra.mxu1 %v3343_v21  ;;  %v3333_v23 = vld [vmem:[%s4133_s13 + $0x60] ss:$12 sps:$4 sm:$0xff]   ;;  %v3334_v24 = vld [vmem:[%s4133_s13 + $0x7c] ss:$12 sps:$4 sm:$0xff]   ;;  %v3345_v25 = vld [vmem:[%s4133_s13 + $0x38] ss:$12 sps:$4 sm:$0xff]  }
 0x1e8   : > { %3017 = vmatprep.subr.bf16.mxu1 %v3731_v13  ;;  %v3336_v26 = vld [vmem:[%s4133_s13 + $0x78] ss:$12 sps:$4 sm:$0xff]   ;;  %v3337_v27 = vld [vmem:[%s4133_s13 + $0x94] ss:$12 sps:$4 sm:$0xff]   ;;  %v3346_v28 = vld [vmem:[%s4133_s13 + $0x50] ss:$12 sps:$4 sm:$0xff]  }
 0x1e9   : > { %v3339_v29 = vld [vmem:[%s4133_s13 + $0x90] ss:$12 sps:$4 sm:$0xff]   ;;  %v3340_v30 = vld [vmem:[%s4133_s13 + $0xac] ss:$12 sps:$4 sm:$0xff]   ;;  %v3347_v31 = vld [vmem:[%s4133_s13 + $0x68] ss:$12 sps:$4 sm:$0xff]  }
 0x1ea   : > { %1102 = vmatpush1.bf16.msra.mxu0 %v3324_v15  ;;  %v3342_v32 = vld [vmem:[%s4133_s13 + $0xa8] ss:$12 sps:$4 sm:$0xff]   ;;  %v4215_v34 = vld [vmem:[#allocation2 + $0x8] sm:$0xff]  ;;  %vm3732_vm2 = vmmov 0   ;;  %v957_v40 = vshrl.u32 %v956_v39, 7  ;;  %vm1217_vm3 = vcmask 261120  }
 0x1eb   : > { %1103 = vmatprep.subr.bf16.mxu0 %v3325_v16  ;;  %3018 = vmatpush3.bf16.msra.mxu1 %v3344_v22  ;;  %v4213_v33 = vld [vmem:[#allocation2] sm:$0xff]  ;;  %v3348_v35 = vld [vmem:[%s4133_s13 + $0x80] ss:$12 sps:$4 sm:$0xff]   ;;  %vm1338_vm4 = vcmask 1043456   ;;  %vm1310_vm5 = vcmask 64512   ;;  %s3733_s12 = smov 96  }
 0x1ec   : > { %3019 = vmatprep.subr.bf16.mxu1 %v3731_v13  ;;  %v921_v36 = vpack.c.bf16 %v4215_v34, %v4213_v33  ;;  %v3349_v37 = vld [vmem:[%s4133_s13 + $0x98] ss:$12 sps:$4 sm:$0xff]   ;;  %v3350_v38 = vld [vmem:[%s4133_s13 + $0xb0] ss:$12 sps:$4 sm:$0xff]   ;;  %3031 = vmatprep.mubr.msk.bf16.mxu1 %vm3732_vm2, %v3731_v13  ;;  %v962_v41 = vsub.s32 1, %v957_v40  ;;  %v958_v43 = vsub.s32 0, %v957_v40 }
 0x1ed   : > { %v954_v42 = vld [vmem:[%s4167_s16] sm:$0x7]  ;;  %v966_v62 = vsub.s32 2, %v957_v40  ;;  %s4643_s13 = sld [smem:[#allocation28_spill]]  ;;  %s3734_s7 = smov 64   ;;  %vm1655_vm6 = vcmask 523520  }
 0x1ee   : > { %1104 = vmatpush1.bf16.msra.mxu0 %v3327_v17  ;;  %v963_v44 = vrot.slane %v954_v42, %v962_v41  ;;  %v959_v45 = vrot.slane %v954_v42, %v958_v43  ;;  %s3735_s17 = smov 32   ;;  %vm1882_vm7 = vcmask 785920   ;;  %vm2109_vm8 = vcmask 1048320   ;;  %s4644_s23 = sld [smem:[#allocation34_spill]] }
 0x1ef   : > { %1105 = vmatprep.subr.bf16.mxu0 %v3328_v18  ;;  %3020 = vmatpush3.bf16.msra.mxu1 %v3345_v25  ;;  %v967_v63 = vrot.slane %v954_v42, %v966_v62  ;;  %s4646_s18 = sld [smem:[#allocation35_spill]]  ;;  %s4648_s19 = sld [smem:[#allocation36_spill]] }
 0x1f0   : > { %3021 = vmatprep.subr.bf16.mxu1 %v3731_v13  ;;  %p2925_p3 = scmp.ne.s32.totalorder %s3707_s24, 1 }
 0x1f2   : > { %1106 = vmatpush1.bf16.msra.mxu0 %v3330_v19 }
 0x1f3   : > { %1107 = vmatprep.subr.bf16.mxu0 %v3331_v20  ;;  %3022 = vmatpush3.bf16.msra.mxu1 %v3346_v28  ;;  %v4265_v8 = vld [vmem:[%s4643_s13] ss:$0 sm:$0xff]  ;;  %v4272_v16 = vld [vmem:[%s4643_s13 + $0x1] ss:$0 sm:$0xff] }
 0x1f4   : > { %3023 = vmatprep.subr.bf16.mxu1 %v3731_v13  ;;  %s4645_s16 = scalar_lea.vmem %s4644_s23, %s4149_s25 }
 0x1f5   : > { %s4649_s8 = scalar_lea.vmem %s4648_s19, %s4149_s25 }
 0x1f6   : > { %1108 = vmatpush1.bf16.msra.mxu0 %v3333_v23 }
 0x1f7   : > { %1109 = vmatprep.subr.bf16.mxu0 %v3334_v24  ;;  %3024 = vmatpush3.bf16.msra.mxu1 %v3347_v31 }
 0x1f8   : > { %3025 = vmatprep.subr.bf16.mxu1 %v3731_v13 }
 0x1fa   : > { %1110 = vmatpush1.bf16.msra.mxu0 %v3336_v26 }
 0x1fb   : > { %1111 = vmatprep.subr.bf16.mxu0 %v3337_v27  ;;  %3026 = vmatpush3.bf16.msra.mxu1 %v3348_v35 }
 0x1fc   : > { %3027 = vmatprep.subr.bf16.mxu1 %v3731_v13 }
 0x1fe   : > { %1112 = vmatpush1.bf16.msra.mxu0 %v3339_v29 }
 0x1ff   : > { %1113 = vmatprep.subr.bf16.mxu0 %v3340_v30  ;;  %3028 = vmatpush3.bf16.msra.mxu1 %v3349_v37 }
 0x200   : > { %3029 = vmatprep.subr.bf16.mxu1 %v3731_v13 }
 0x202   : > { %1114 = vmatpush1.bf16.msra.mxu0 %v3342_v32 }
 0x203   : > { %3059 = vmatprep.subr.bf16.mxu0 %v3731_v13  ;;  %3030 = vmatpush3.bf16.msra.mxu1 %v3350_v38 }
 0x204   : > { %3035 = vmatprep.subr.bf16.mxu1 %v3731_v13 }
 0x205   : > { %1132 = vmatmul.mubr.bf16.vlgmr.msra.gmra.mrb[0].mxu0 %v921_v36 }
 0x206   : > { %3061 = vmatprep.mubr.msk.bf16.mxu0 %vm3732_vm2, %v3731_v13  ;;  %3032 = vmatmul.mubr.bf16.vlgmr.msra.gmra.mrb[0].mxu1 %v921_v36 }
 0x207   : > { %3037 = vmatprep.mubr.msk.bf16.mxu1 %vm3732_vm2, %v3731_v13 }
 0x2d8   : > { %v1133_v46 = vpop.f32.mrb[0].mxu0 }
 0x2d9   : > { %v1135_v47 = vpop.f32.mrb[1].mxu0  ;;  %v1134_v51 = vadd.f32 %v1133_v46, %v959_v45  ;;  %v1176_v0 = vpop.f32.mrb[0].mxu1 }
 0x2da   : > { %v1136_v48 = vadd.f32 %v1135_v47, %v963_v44  ;;  %v1137_v49 = vpop.f32.mrb[2].mxu0  ;;  %v1177_v1 = vadd.f32 %v1176_v0, %v967_v63  ;;  %v3033_v2 = vpop.f32.mrb[1].mxu1 }
 0x2db   : > { %v1139_v50 = vpop.f32.mrb[3].mxu0  ;;  %v1183_v55 = vmul.f32 0.17677669, %v1134_v51  ;;  %v1138_v58 = vadd.f32 %v1137_v49, %v959_v45  ;;  %v1179_v3 = vpop.f32.mrb[2].mxu1 }
 0x2dc   : > { %v4235_v52 = vpack.c.bf16 %v1136_v48, %v1136_v48  ;;  %v1140_v53 = vadd.f32 %v1139_v50, %v963_v44  ;;  %v4257_v4 = vpack.c.bf16 %v1177_v1, %v1177_v1  ;;  %v1180_v5 = vadd.f32 %v1179_v3, %v967_v63  ;;  %v3034_v6 = vpop.f32.mrb[3].mxu1 }
 0x2dd   : > { %v4242_v57 = vpack.c.bf16 %v1183_v55, %v1183_v55  ;;  %v1184_v60 = vmul.f32 0.17677669, %v1138_v58 }
 0x2de   : > { %v1222_v54 = vsel %vm1217_vm3, %v4235_v52, 0  ;;  %v4240_v56 = vpack.c.bf16 %v1140_v53, %v1140_v53  ;;  %v1340_v7 = vsel %vm1338_vm4, %v4257_v4, 0  ;;  %v4288_v39 = vpack.c.bf16 %v1180_v5, %v1180_v5 }
 0x2df   : > { %3036 = vmatpush3.bf16.xpose.msra.mxu1 %v1222_v54  ;;  %v4251_v61 = vpack.c.bf16 %v1184_v60, %v1184_v60 }
 0x2e0   : > { %3041 = vmatprep.subr.bf16.mxu1 %v3731_v13  ;;  %v1268_v59 = vsel %vm1217_vm3, %v4240_v56, 0  ;;  %v1386_v42 = vsel %vm1338_vm4, %v4288_v39, 0 }
 0x2e6   : > { %3038 = vmatmul.mubr.msk.bf16.vlgmr.msra.gmra.mrb[4].mxu1 %vm1217_vm3, %v4242_v57 }
 0x2e7   : > { %3042 = vmatpush3.bf16.xpose.msra.mxu1 %v1268_v59  ;;  %3043 = vmatprep.mubr.msk.bf16.mxu1 %vm3732_vm2, %v3731_v13 }
 0x2e8   : > { %3047 = vmatprep.subr.bf16.mxu1 %v3731_v13 }
 0x2ee   : > { %3044 = vmatmul.mubr.msk.bf16.vlgmr.msra.gmra.mrb[8].mxu1 %vm1217_vm3, %v4251_v61 }
 0x2ef   : > { %3049 = vmatprep.mubr.msk.bf16.mxu1 %vm3732_vm2, %v3731_v13  ;;  %3048 = vmatpush3.bf16.msra.mxu1 %v1340_v7 }
 0x2f0   : > { %3053 = vmatprep.subr.bf16.mxu1 %v3731_v13 }
 0x3b9   : > { %v1258_v9 = vpop.f32.mrb[4].mxu1 }
 0x3ba   : > { %v1259_v10 = vadd.f32 %v4265_v8, %v1258_v9  ;;  %v3039_v11 = vpop.f32.mrb[5].mxu1 }
 0x3bb   : > { %v1261_v12 = vpop.f32.mrb[6].mxu1 }
 0x3bc   : > { %v3040_v14 = vpop.f32.mrb[7].mxu1  ;;  %v1311_v15 = vsel %vm1310_vm5, %v1259_v10, -inf }
 0x3bd   : > { %1312 = vmax.xlane.f32.xlu0 %v1311_v15 }
 0x3c1   : > { %v1304_v17 = vpop.f32.mrb[8].mxu1 }
 0x3c2   : > { %v1305_v18 = vadd.f32 %v4272_v16, %v1304_v17  ;;  %v3045_v19 = vpop.f32.mrb[9].mxu1 }
 0x3c3   : > { %v1307_v20 = vpop.f32.mrb[10].mxu1 }
 0x3c4   : > { %v3046_v21 = vpop.f32.mrb[11].mxu1  ;;  %v1314_v22 = vsel %vm1310_vm5, %v1305_v18, -inf }
 0x3c5   : > { %1315 = vmax.xlane.f32.xlu0 %v1314_v22 }
 0x3db   : > { %1432 = vrot.lane.b32.xlu0 %v4235_v52, %s3733_s12 }
 0x44a   : > { %v1313_v23 = vpop.xlane.xlu0 %1312 }
 0x44b   : > { %v1317_v24 = vsub.f32 %v1259_v10, %v1313_v23 }
 0x44d   : > { %v1319_v25 = vmul.f32 1.442695, %v1317_v24 }
 0x44f   : > { %3375 = vpow2.f32 %v1319_v25 }
 0x452   : > { %v1316_v26 = vpop.xlane.xlu0 %1315 }
 0x453   : > { %v1318_v31 = vsub.f32 %v1305_v18, %v1316_v26 }
 0x455   : > { %v1321_v32 = vmul.f32 1.442695, %v1318_v31 }
 0x456   : > { %v1433_v27 = vpop.permute.xlu0 %1432 }
 0x457   : > { %v1438_v28 = vsel %vm1217_vm3, %v1433_v27, 0  ;;  %3377 = vpow2.f32 %v1321_v32 }
 0x458   : > { %3060 = vmatpush3.bf16.xpose.msra.mxu0 %v1438_v28 }
 0x459   : > { %v3376_v29 = vpop.eup %3375  ;;  %3071 = vmatprep.subr.bf16.mxu0 %v3731_v13 }
 0x45a   : > { %v1323_v30 = vsel %vm1310_vm5, %v3376_v29, 0.0 }
 0x45b   : > { %1324 = vadd.xlane.f32.xlu1 %v1323_v30 }
 0x461   : > { %v3378_v35 = vpop.eup %3377 }
 0x462   : > { %v1326_v36 = vsel %vm1310_vm5, %v3378_v35, 0.0 }
 0x46c   : > { %1482 = vrot.lane.b32.xlu1 %v4240_v56, %s3733_s12 }
 0x490   : > { %1327 = vadd.xlane.f32.xlu1 %v1326_v36 }
 0x4a1   : > { %1430 = vrot.lane.b32.xlu1 %v4242_v57, %s3733_s12 }
 0x4a5   : > { %1480 = vrot.lane.b32.xlu1 %v4251_v61, %s3733_s12 }
 0x4e8   : > { %v1325_v37 = vpop.xlane.xlu1 %1324 }
 0x4e9   : > { %3379 = vrcp.f32 %v1325_v37 }
 0x4ec   : > { %v1483_v43 = vpop.permute.xlu1 %1482 }
 0x4ed   : > { %v1488_v49 = vsel %vm1217_vm3, %v1483_v43, 0 }
 0x4f3   : > { %v3380_v38 = vpop.eup %3379 }
 0x4f4   : > { %v1331_v40 = vmul.f32 %v3380_v38, %v3376_v29 }
 0x4f6   : > { %v1333_v41 = vpack.c.bf16 %v1331_v40, %v1331_v40 }
 0x4f8   : > { %3050 = vmatmul.mubr.msk.bf16.vlgmr.msra.gmra.mrb[12].mxu1 %vm1310_vm5, %v1333_v41 }
 0x4f9   : > { %3054 = vmatpush3.bf16.msra.mxu1 %v1386_v42  ;;  %3055 = vmatprep.mubr.msk.bf16.mxu1 %vm3732_vm2, %v3731_v13 }
 0x4fa   : > { %3065 = vmatprep.subr.bf16.mxu1 %v3731_v13 }
 0x51d   : > { %v1328_v44 = vpop.xlane.xlu1 %1327 }
 0x51e   : > { %3381 = vrcp.f32 %v1328_v44 }
 0x521   : > { %v1431_v45 = vpop.permute.xlu1 %1430 }
 0x522   : > { %3062 = vmatmul.mubr.msk.bf16.vlgmr.msra.gmra.mrb[4].mxu0 %vm1217_vm3, %v1431_v45 }
 0x523   : > { %3073 = vmatprep.mubr.msk.bf16.mxu0 %vm3732_vm2, %v3731_v13 }
 0x525   : > { %v1481_v50 = vpop.permute.xlu1 %1480 }
 0x528   : > { %v3382_v46 = vpop.eup %3381 }
 0x529   : > { %v1332_v47 = vmul.f32 %v3382_v46, %v3378_v35 }
 0x52b   : > { %v1334_v48 = vpack.c.bf16 %v1332_v47, %v1332_v47 }
 0x52d   : > { %3056 = vmatmul.mubr.msk.bf16.vlgmr.msra.gmra.mrb[16].mxu1 %vm1310_vm5, %v1334_v48 }
 0x52e   : > { %3066 = vmatpush3.bf16.xpose.msra.mxu1 %v1488_v49  ;;  %3067 = vmatprep.mubr.msk.bf16.mxu1 %vm3732_vm2, %v3731_v13 }
 0x52f   : > { %3077 = vmatprep.subr.bf16.mxu1 %v3731_v13 }
 0x535   : > { %3068 = vmatmul.mubr.msk.bf16.vlgmr.msra.gmra.mrb[20].mxu1 %vm1217_vm3, %v1481_v50 }
 0x536   : > { %3079 = vmatprep.mubr.msk.bf16.mxu1 %vm3732_vm2, %v3731_v13 }
 0x5cb   : > { %v1376_v51 = vpop.f32.mrb[12].mxu1 }
 0x5cc   : > { %v3051_v53 = vpop.f32.mrb[13].mxu1 }
 0x5cd   : > { %v1379_v54 = vpop.f32.mrb[14].mxu1 }
 0x5ce   : > { %v3052_v55 = vpop.f32.mrb[15].mxu1 }
 0x5f5   : > { %v1474_v58 = vpop.f32.mrb[4].mxu0 }
 0x5f6   : > { %v1475_v59 = vadd.f32 %v4265_v8, %v1474_v58  ;;  %v3063_v60 = vpop.f32.mrb[5].mxu0 }
 0x5f7   : > { %v1477_v62 = vpop.f32.mrb[6].mxu0 }
 0x5f8   : > { %v3064_v63 = vpop.f32.mrb[7].mxu0  ;;  %v1530_v0 = vsel %vm1310_vm5, %v1475_v59, -inf }
 0x5f9   : > { %1531 = vmax.xlane.f32.xlu0 %v1530_v0 }
 0x600   : > { %v1422_v1 = vpop.f32.mrb[16].mxu1 }
 0x601   : > { %v1428_v2 = vpack.c.bf16 %v1422_v1, %v1376_v51  ;;  %v3057_v3 = vpop.f32.mrb[17].mxu1 }
 0x602   : > { %v1425_v5 = vpop.f32.mrb[18].mxu1 }
 0x603   : > { %1429 = vst.msk [vmem:[#allocation3] sm:$0xff] %vm1217_vm3, %v1428_v2  ;;  %v3058_v6 = vpop.f32.mrb[19].mxu1 }
 0x608   : > { %v1524_v7 = vpop.f32.mrb[20].mxu1 }
 0x609   : > { %v1525_v9 = vadd.f32 %v4272_v16, %v1524_v7  ;;  %v3069_v10 = vpop.f32.mrb[21].mxu1 }
 0x60a   : > { %v1527_v11 = vpop.f32.mrb[22].mxu1 }
 0x60b   : > { %v3070_v12 = vpop.f32.mrb[23].mxu1  ;;  %v1533_v14 = vsel %vm1310_vm5, %v1525_v9, -inf }
 0x60c   : > { %1534 = vmax.xlane.f32.xlu1 %v1533_v14 }
 0x61d   : > { %1602 = vrot.lane.b32.xlu1 %v4288_v39, %s3733_s12 }
 0x621   : > { %1659 = vrot.lane.b32.xlu1 %v4235_v52, %s3734_s7 }
 0x625   : > { %1709 = vrot.lane.b32.xlu1 %v4240_v56, %s3734_s7 }
 0x629   : > { %1707 = vrot.lane.b32.xlu1 %v4251_v61, %s3734_s7 }
 0x686   : > { %v1532_v15 = vpop.xlane.xlu0 %1531 }
 0x687   : > { %v1536_v17 = vsub.f32 %v1475_v59, %v1532_v15 }
 0x689   : > { %v1538_v18 = vmul.f32 1.442695, %v1536_v17 }
 0x68b   : > { %3383 = vpow2.f32 %v1538_v18 }
 0x695   : > { %v3384_v19 = vpop.eup %3383 }
 0x696   : > { %v1542_v20 = vsel %vm1310_vm5, %v3384_v19, 0.0 }
 0x697   : > { %1543 = vadd.xlane.f32.xlu0 %v1542_v20 }
 0x699   : > { %v1535_v21 = vpop.xlane.xlu1 %1534 }
 0x69a   : > { %v1537_v22 = vsub.f32 %v1525_v9, %v1535_v21 }
 0x69c   : > { %v1540_v23 = vmul.f32 1.442695, %v1537_v22 }
 0x69d   : > { %v1603_v24 = vpop.permute.xlu1 %1602 }
 0x69e   : > { %3385 = vpow2.f32 %v1540_v23  ;;  %v1608_v25 = vsel %vm1338_vm4, %v1603_v24, 0 }
 0x69f   : > { %3078 = vmatpush3.bf16.msra.mxu1 %v1608_v25 }
 0x6a0   : > { %3089 = vmatprep.subr.bf16.mxu1 %v3731_v13 }
 0x6a1   : > { %v1660_v36 = vpop.permute.xlu1 %1659 }
 0x6a2   : > { %v1665_v42 = vsel %vm1217_vm3, %v1660_v36, 0 }
 0x6a5   : > { %v1710_v41 = vpop.permute.xlu1 %1709 }
 0x6a6   : > { %v1715_v44 = vsel %vm1217_vm3, %v1710_v41, 0 }
 0x6a8   : > { %v3386_v26 = vpop.eup %3385 }
 0x6a9   : > { %v1545_v27 = vsel %vm1310_vm5, %v3386_v26, 0.0  ;;  %v1708_v46 = vpop.permute.xlu1 %1707 }
 0x6aa   : > { %1546 = vadd.xlane.f32.xlu0 %v1545_v27 }
 0x6c0   : > { %1554 = vrot.lane.b32.xlu0 %v4257_v4, %s3733_s12 }
 0x6c4   : > { %1657 = vrot.lane.b32.xlu0 %v4242_v57, %s3734_s7 }
 0x724   : > { %v1544_v28 = vpop.xlane.xlu0 %1543 }
 0x725   : > { %3387 = vrcp.f32 %v1544_v28 }
 0x72f   : > { %v3388_v29 = vpop.eup %3387 }
 0x730   : > { %v1550_v31 = vmul.f32 %v3388_v29, %v3384_v19 }
 0x732   : > { %v1552_v37 = vpack.c.bf16 %v1550_v31, %v1550_v31 }
 0x737   : > { %v1547_v30 = vpop.xlane.xlu0 %1546 }
 0x738   : > { %3389 = vrcp.f32 %v1547_v30 }
 0x73b   : > { %v1555_v32 = vpop.permute.xlu0 %1554 }
 0x73c   : > { %v1560_v35 = vsel %vm1338_vm4, %v1555_v32, 0 }
 0x73d   : > { %3072 = vmatpush3.bf16.msra.mxu0 %v1560_v35 }
 0x73e   : > { %3083 = vmatprep.subr.bf16.mxu0 %v3731_v13 }
 0x73f   : > { %v1658_v45 = vpop.permute.xlu0 %1657 }
 0x740   : > { %3074 = vmatmul.mubr.msk.bf16.vlgmr.msra.gmra.mrb[8].mxu0 %vm1310_vm5, %v1552_v37 }
 0x741   : > { %3085 = vmatprep.mubr.msk.bf16.mxu0 %vm3732_vm2, %v3731_v13 }
 0x742   : > { %v3390_v38 = vpop.eup %3389 }
 0x743   : > { %v1551_v40 = vmul.f32 %v3390_v38, %v3386_v26 }
 0x745   : > { %v1553_v43 = vpack.c.bf16 %v1551_v40, %v1551_v40 }
 0x746   : > { %3084 = vmatpush3.bf16.xpose.msra.mxu0 %v1665_v42 }
 0x747   : > { %3080 = vmatmul.mubr.msk.bf16.vlgmr.msra.gmra.mrb[24].mxu1 %vm1310_vm5, %v1553_v43  ;;  %3095 = vmatprep.subr.bf16.mxu0 %v3731_v13 }
 0x748   : > { %3090 = vmatpush3.bf16.xpose.msra.mxu1 %v1715_v44  ;;  %3091 = vmatprep.mubr.msk.bf16.mxu1 %vm3732_vm2, %v3731_v13 }
 0x749   : > { %3101 = vmatprep.subr.bf16.mxu1 %v3731_v13 }
 0x74d   : > { %3086 = vmatmul.mubr.msk.bf16.vlgmr.msra.gmra.mrb[12].mxu0 %vm1217_vm3, %v1658_v45 }
 0x74e   : > { %3097 = vmatprep.mubr.msk.bf16.mxu0 %vm3732_vm2, %v3731_v13 }
 0x74f   : > { %3092 = vmatmul.mubr.msk.bf16.vlgmr.msra.gmra.mrb[28].mxu1 %vm1217_vm3, %v1708_v46 }
 0x750   : > { %3103 = vmatprep.mubr.msk.bf16.mxu1 %vm3732_vm2, %v3731_v13 }
 0x813   : > { %v4346_v47 = vpop.f32.mrb[8].mxu0 }
 0x814   : > { %v3075_v48 = vpop.f32.mrb[9].mxu0 }
 0x815   : > { %v1599_v49 = vpop.f32.mrb[10].mxu0 }
 0x816   : > { %v3076_v50 = vpop.f32.mrb[11].mxu0 }
 0x81a   : > { %v4348_v51 = vpop.f32.mrb[24].mxu1 }
 0x81b   : > { %v1650_v53 = vpack.c.bf16 %v4348_v51, %v4346_v47  ;;  %v3081_v54 = vpop.f32.mrb[25].mxu1 }
 0x81c   : > { %v1647_v55 = vpop.f32.mrb[26].mxu1 }
 0x81d   : > { %v3082_v58 = vpop.f32.mrb[27].mxu1 }
 0x820   : > { %v1701_v59 = vpop.f32.mrb[12].mxu0 }
 0x821   : > { %v1702_v60 = vadd.f32 %v4265_v8, %v1701_v59  ;;  %v3087_v62 = vpop.f32.mrb[13].mxu0 }
 0x822   : > { %v1704_v63 = vpop.f32.mrb[14].mxu0  ;;  %v1751_v0 = vpop.f32.mrb[28].mxu1 }
 0x823   : > { %v1752_v1 = vadd.f32 %v4272_v16, %v1751_v0  ;;  %v3088_v2 = vpop.f32.mrb[15].mxu0  ;;  %v3093_v3 = vpop.f32.mrb[29].mxu1  ;;  %v1757_v5 = vsel %vm1310_vm5, %v1702_v60, -inf }
 0x824   : > { %1758 = vmax.xlane.f32.xlu0 %v1757_v5  ;;  %v1754_v6 = vpop.f32.mrb[30].mxu1 }
 0x825   : > { %v3094_v7 = vpop.f32.mrb[31].mxu1  ;;  %v1760_v9 = vsel %vm1310_vm5, %v1752_v1, -inf }
 0x826   : > { %1761 = vmax.xlane.f32.xlu1 %v1760_v9 }
 0x837   : > { %1829 = vrot.lane.b32.xlu1 %v4288_v39, %s3734_s7 }
 0x83b   : > { %1886 = vrot.lane.b32.xlu1 %v4235_v52, %s3735_s17 }
 0x83f   : > { %1936 = vrot.lane.b32.xlu1 %v4240_v56, %s3735_s17 }
 0x843   : > { %1934 = vrot.lane.b32.xlu1 %v4251_v61, %s3735_s17 }
 0x8b1   : > { %v1759_v10 = vpop.xlane.xlu0 %1758 }
 0x8b2   : > { %v1763_v11 = vsub.f32 %v1702_v60, %v1759_v10 }
 0x8b3   : > { %v1762_v12 = vpop.xlane.xlu1 %1761 }
 0x8b4   : > { %v1765_v14 = vmul.f32 1.442695, %v1763_v11  ;;  %v1764_v15 = vsub.f32 %v1752_v1, %v1762_v12 }
 0x8b6   : > { %3391 = vpow2.f32 %v1765_v14  ;;  %v1767_v17 = vmul.f32 1.442695, %v1764_v15 }
 0x8b7   : > { %v1830_v18 = vpop.permute.xlu1 %1829 }
 0x8b8   : > { %3393 = vpow2.f32 %v1767_v17  ;;  %v1835_v19 = vsel %vm1338_vm4, %v1830_v18, 0 }
 0x8b9   : > { %3102 = vmatpush3.bf16.msra.mxu1 %v1835_v19 }
 0x8ba   : > { %3113 = vmatprep.subr.bf16.mxu1 %v3731_v13 }
 0x8bb   : > { %v1887_v26 = vpop.permute.xlu1 %1886 }
 0x8bf   : > { %v1937_v31 = vpop.permute.xlu1 %1936 }
 0x8c0   : > { %v3392_v52 = vpop.eup %3391  ;;  %v1942_v35 = vsel %vm1217_vm3, %v1937_v31, 0 }
 0x8c1   : > { %v1769_v56 = vsel %vm1310_vm5, %v3392_v52, 0.0 }
 0x8c2   : > { %v3394_v20 = vpop.eup %3393  ;;  %1770 = vadd.xlane.f32.xlu0 %v1769_v56 }
 0x8c3   : > { %v1772_v61 = vsel %vm1310_vm5, %v3394_v20, 0.0  ;;  %v1935_v37 = vpop.permute.xlu1 %1934 }
 0x8c6   : > { %1773 = vadd.xlane.f32.xlu0 %v1772_v61 }
 0x8dc   : > { %1781 = vrot.lane.b32.xlu0 %v4257_v4, %s3734_s7 }
 0x8e0   : > { %1884 = vrot.lane.b32.xlu0 %v4242_v57, %s3735_s17  ;;  %v1892_v57 = vsel %vm1217_vm3, %v1887_v26, 0  ;;  %v3356_v26 = vld [vmem:[%s4139_s20 + $0x28] sm:$0xff]  }
 0x94f   : > { %v1771_v21 = vpop.xlane.xlu0 %1770 }
 0x950   : > { %3395 = vrcp.f32 %v1771_v21  ;;  %v3351_v21 = vld [vmem:[%s4139_s20] sm:$0xff]  }
 0x953   : > { %v1774_v22 = vpop.xlane.xlu0 %1773 }
 0x954   : > { %3397 = vrcp.f32 %v1774_v22  ;;  %v3352_v22 = vld [vmem:[%s4139_s20 + $0x8] sm:$0xff]  }
 0x957   : > { %v1782_v23 = vpop.permute.xlu0 %1781 }
 0x958   : > { %v1787_v24 = vsel %vm1338_vm4, %v1782_v23, 0  ;;  %v3353_v23 = vld [vmem:[%s4139_s20 + $0x10] sm:$0xff]  }
 0x959   : > { %3096 = vmatpush3.bf16.msra.mxu0 %v1787_v24  ;;  %v3354_v24 = vld [vmem:[%s4139_s20 + $0x18] sm:$0xff]  }
 0x95a   : > { %v3396_v25 = vpop.eup %3395  ;;  %3107 = vmatprep.subr.bf16.mxu0 %v3731_v13 }
 0x95b   : > { %v1777_v27 = vmul.f32 %v3396_v25, %v3392_v52  ;;  %v1885_v36 = vpop.permute.xlu0 %1884  ;;  %v3355_v25 = vld [vmem:[%s4139_s20 + $0x20] sm:$0xff]  }
 0x95d   : > { %v1779_v28 = vpack.c.bf16 %v1777_v27, %v1777_v27  ;;  %v3357_v27 = vld [vmem:[%s4139_s20 + $0x30] sm:$0xff]  }
 0x95e   : > { %v3398_v29 = vpop.eup %3397 }
 0x95f   : > { %v1778_v30 = vmul.f32 %v3398_v29, %v3394_v20  ;;  %3098 = vmatmul.mubr.msk.bf16.vlgmr.msra.gmra.mrb[16].mxu0 %vm1310_vm5, %v1779_v28  ;;  %v3358_v28 = vld [vmem:[%s4139_s20 + $0x38] sm:$0xff]  }
 0x960   : > { %3109 = vmatprep.mubr.msk.bf16.mxu0 %vm3732_vm2, %v3731_v13 }
 0x961   : > { %v1780_v32 = vpack.c.bf16 %v1778_v30, %v1778_v30 }
 0x962   : > { %3108 = vmatpush3.bf16.xpose.msra.mxu0 %v1892_v57 }
 0x963   : > { %3104 = vmatmul.mubr.msk.bf16.vlgmr.msra.gmra.mrb[32].mxu1 %vm1310_vm5, %v1780_v32  ;;  %3119 = vmatprep.subr.bf16.mxu0 %v3731_v13 }
 0x964   : > { %3114 = vmatpush3.bf16.xpose.msra.mxu1 %v1942_v35  ;;  %3115 = vmatprep.mubr.msk.bf16.mxu1 %vm3732_vm2, %v3731_v13 }
 0x965   : > { %3125 = vmatprep.subr.bf16.mxu1 %v3731_v13 }
 0x969   : > { %3110 = vmatmul.mubr.msk.bf16.vlgmr.msra.gmra.mrb[20].mxu0 %vm1217_vm3, %v1885_v36 }
 0x96a   : > { %3121 = vmatprep.mubr.msk.bf16.mxu0 %vm3732_vm2, %v3731_v13 }
 0x96b   : > { %3116 = vmatmul.mubr.msk.bf16.vlgmr.msra.gmra.mrb[36].mxu1 %vm1217_vm3, %v1935_v37 }
 0x96c   : > { %3127 = vmatprep.mubr.msk.bf16.mxu1 %vm3732_vm2, %v3731_v13 }
 0xa32   : > { %v1823_v38 = vpop.f32.mrb[16].mxu0 }
 0xa33   : > { %v3099_v40 = vpop.f32.mrb[17].mxu0 }
 0xa34   : > { %v1826_v41 = vpop.f32.mrb[18].mxu0 }
 0xa35   : > { %v3100_v42 = vpop.f32.mrb[19].mxu0 }
 0xa36   : > { %v1871_v43 = vpop.f32.mrb[32].mxu1  ;;  %v2894_v42 = vld [vmem:[%s4645_s16] ss:$0 sm:$0xff] }
 0xa37   : > { %v1877_v44 = vpack.c.bf16 %v1871_v43, %v1823_v38  ;;  %v3105_v45 = vpop.f32.mrb[33].mxu1 }
 0xa38   : > { %v1874_v46 = vpop.f32.mrb[34].mxu1 }
 0xa39   : > { %v3106_v48 = vpop.f32.mrb[35].mxu1 }
 0xa3c   : > { %v1928_v49 = vpop.f32.mrb[20].mxu0 }
 0xa3d   : > { %v1929_v50 = vadd.f32 %v4265_v8, %v1928_v49  ;;  %v3111_v54 = vpop.f32.mrb[21].mxu0 }
 0xa3e   : > { %v1931_v55 = vpop.f32.mrb[22].mxu0  ;;  %v1978_v58 = vpop.f32.mrb[36].mxu1 }
 0xa3f   : > { %v1979_v59 = vadd.f32 %v4272_v16, %v1978_v58  ;;  %v3112_v60 = vpop.f32.mrb[23].mxu0  ;;  %v3117_v62 = vpop.f32.mrb[37].mxu1  ;;  %v1984_v63 = vsel %vm1310_vm5, %v1929_v50, -inf  ;;  %v3359_v55 = vld [vmem:[%s4141_s15] sm:$0xff]  }
 0xa40   : > { %1985 = vmax.xlane.f32.xlu0 %v1984_v63  ;;  %v1981_v0 = vpop.f32.mrb[38].mxu1 }
 0xa41   : > { %v3118_v1 = vpop.f32.mrb[39].mxu1  ;;  %v1987_v2 = vsel %vm1310_vm5, %v1979_v59, -inf }
 0xa42   : > { %1988 = vmax.xlane.f32.xlu1 %v1987_v2  ;;  %v3361_v2 = vld [vmem:[%s4141_s15 + $0x10] sm:$0xff]  }
 0xa53   : > { %2056 = vrot.lane.b32.xlu1 %v4288_v39, %s3735_s17 }
 0xa57   : > { %1652 = vrot.lane.b32.xlu1 %v1650_v53, %s3735_s17 }
 0xa5b   : > { %1879 = vrot.lane.b32.xlu1 %v1877_v44, %s3734_s7 }
 0xacd   : > { %v1986_v8 = vpop.xlane.xlu0 %1985 }
 0xace   : > { %v1990_v16 = vsub.f32 %v1929_v50, %v1986_v8  ;;  %v3362_v8 = vld [vmem:[%s4141_s15 + $0x18] sm:$0xff]  }
 0xacf   : > { %v1989_v3 = vpop.xlane.xlu1 %1988 }
 0xad0   : > { %v1992_v5 = vmul.f32 1.442695, %v1990_v16  ;;  %v1991_v6 = vsub.f32 %v1979_v59, %v1989_v3  ;;  %v3363_v16 = vld [vmem:[%s4141_s15 + $0x20] sm:$0xff]   ;;  %v3364_v3 = vld [vmem:[%s4141_s15 + $0x28] sm:$0xff]  }
 0xad2   : > { %3399 = vpow2.f32 %v1992_v5  ;;  %v1994_v7 = vmul.f32 1.442695, %v1991_v6  ;;  %v3365_v5 = vld [vmem:[%s4141_s15 + $0x30] sm:$0xff]   ;;  %v3366_v6 = vld [vmem:[%s4141_s15 + $0x38] sm:$0xff]  }
 0xad3   : > { %v2057_v9 = vpop.permute.xlu1 %2056 }
 0xad4   : > { %3401 = vpow2.f32 %v1994_v7  ;;  %v2062_v10 = vsel %vm1338_vm4, %v2057_v9, 0 }
 0xad5   : > { %3126 = vmatpush3.bf16.msra.mxu1 %v2062_v10 }
 0xad6   : > { %3151 = vmatprep.subr.bf16.mxu1 %v3731_v13 }
 0xad7   : > { %v1653_v39 = vpop.permute.xlu1 %1652 }
 0xad8   : > { %1656 = vst.msk [vmem:[#allocation3] sm:$0xff] %vm1655_vm6, %v1653_v39 }
 0xadb   : > { %v1880_v47 = vpop.permute.xlu1 %1879 }
 0xadc   : > { %v3400_v51 = vpop.eup %3399  ;;  %1883 = vst.msk [vmem:[#allocation3] sm:$0xff] %vm1882_vm7, %v1880_v47 }
 0xadd   : > { %v1996_v53 = vsel %vm1310_vm5, %v3400_v51, 0.0 }
 0xade   : > { %v3402_v11 = vpop.eup %3401  ;;  %1997 = vadd.xlane.f32.xlu0 %v1996_v53 }
 0xadf   : > { %v1999_v12 = vsel %vm1310_vm5, %v3402_v11, 0.0 }
 0xae2   : > { %2000 = vadd.xlane.f32.xlu0 %v1999_v12 }
 0xaf8   : > { %2008 = vrot.lane.b32.xlu0 %v4257_v4, %s3735_s17 }
 0xb6b   : > { %v1998_v14 = vpop.xlane.xlu0 %1997 }
 0xb6c   : > { %3403 = vrcp.f32 %v1998_v14 }
 0xb6f   : > { %v2001_v15 = vpop.xlane.xlu0 %2000 }
 0xb70   : > { %3405 = vrcp.f32 %v2001_v15 }
 0xb73   : > { %v2009_v17 = vpop.permute.xlu0 %2008 }
 0xb74   : > { %v2014_v18 = vsel %vm1338_vm4, %v2009_v17, 0 }
 0xb75   : > { %3120 = vmatpush3.bf16.msra.mxu0 %v2014_v18  ;;  %v2904_v18 = vld [vmem:[%s4649_s8] ss:$0 sm:$0xff] }
 0xb76   : > { %v3404_v19 = vpop.eup %3403  ;;  %3131 = vmatprep.subr.bf16.mxu0 %v3731_v13 }
 0xb77   : > { %v2004_v52 = vmul.f32 %v3404_v19, %v3400_v51 }
 0xb79   : > { %v2006_v56 = vpack.c.bf16 %v2004_v52, %v2004_v52 }
 0xb7a   : > { %v3406_v20 = vpop.eup %3405 }
 0xb7b   : > { %v2005_v61 = vmul.f32 %v3406_v20, %v3402_v11  ;;  %3122 = vmatmul.mubr.msk.bf16.vlgmr.msra.gmra.mrb[24].mxu0 %vm1310_vm5, %v2006_v56 }
 0xb7c   : > { %3147 = vmatprep.mubr.msk.bf16.mxu0 %vm3732_vm2, %v3731_v13  ;;  %3132 = vmatpush3.bf16.msra.mxu0 %v3351_v21  ;;  %v3369_v21 = vld [vmem:[%s4185_s26 + $0x10] sm:$0xff]  }
 0xb7d   : > { %v2007_v4 = vpack.c.bf16 %v2005_v61, %v2005_v61  ;;  %3133 = vmatprep.subr.bf16.mxu0 %v3731_v13  ;;  %v3367_v61 = vld [vmem:[%s4185_s26] sm:$0xff]  }
 0xb7f   : > { %3128 = vmatmul.mubr.msk.bf16.vlgmr.msra.gmra.mrb[40].mxu1 %vm1310_vm5, %v2007_v4  ;;  %v3368_v4 = vld [vmem:[%s4185_s26 + $0x8] sm:$0xff]  }
 0xb80   : > { %3167 = vmatprep.mubr.msk.bf16.mxu1 %vm3732_vm2, %v3731_v13  ;;  %3134 = vmatpush3.bf16.msra.mxu0 %v3352_v22  ;;  %v3370_v22 = vld [vmem:[%s4185_s26 + $0x18] sm:$0xff]  }
 0xb81   : > { %3135 = vmatprep.subr.bf16.mxu0 %v3731_v13  ;;  %3152 = vmatpush3.bf16.msra.mxu1 %v3359_v55 }
 0xb82   : > { %3153 = vmatprep.subr.bf16.mxu1 %v3731_v13 }
 0xb84   : > { %3136 = vmatpush3.bf16.msra.mxu0 %v3353_v23  ;;  %v3371_v23 = vld [vmem:[%s4185_s26 + $0x20] sm:$0xff]  }
 0xb85   : > { %3137 = vmatprep.subr.bf16.mxu0 %v3731_v13 }
 0xb88   : > { %3138 = vmatpush3.bf16.msra.mxu0 %v3354_v24  ;;  %v3372_v24 = vld [vmem:[%s4185_s26 + $0x28] sm:$0xff]  }
 0xb89   : > { %3139 = vmatprep.subr.bf16.mxu0 %v3731_v13 }
 0xb8c   : > { %3140 = vmatpush3.bf16.msra.mxu0 %v3355_v25  ;;  %v3373_v25 = vld [vmem:[%s4185_s26 + $0x30] sm:$0xff]  }
 0xb8d   : > { %3141 = vmatprep.subr.bf16.mxu0 %v3731_v13 }
 0xb90   : > { %3142 = vmatpush3.bf16.msra.mxu0 %v3356_v26  ;;  %v3374_v26 = vld [vmem:[%s4185_s26 + $0x38] sm:$0xff]  }
 0xb91   : > { %3143 = vmatprep.subr.bf16.mxu0 %v3731_v13 }
 0xb94   : > { %3144 = vmatpush3.bf16.msra.mxu0 %v3357_v27  ;;  %v2905_v27 = vld [vmem:[%s840_s0] ss:$0 sm:$0xff] }
 0xb95   : > { %3145 = vmatprep.subr.bf16.mxu0 %v3731_v13 }
 0xb98   : > { %3146 = vmatpush3.bf16.msra.mxu0 %v3358_v28 }
 0xb99   : > { %3171 = vmatprep.subr.bf16.mxu0 %v3731_v13 }
 0xc4e   : > { %v2050_v29 = vpop.f32.mrb[24].mxu0 }
 0xc4f   : > { %v3123_v30 = vpop.f32.mrb[25].mxu0 }
 0xc50   : > { %v2053_v31 = vpop.f32.mrb[26].mxu0 }
 0xc51   : > { %v3124_v57 = vpop.f32.mrb[27].mxu0 }
 0xc52   : > { %v2098_v32 = vpop.f32.mrb[40].mxu1 }
 0xc53   : > { %v2104_v35 = vpack.c.bf16 %v2098_v32, %v2050_v29  ;;  %v3129_v36 = vpop.f32.mrb[41].mxu1 }
 0xc54   : > { %v2101_v37 = vpop.f32.mrb[42].mxu1 }
 0xc55   : > { %2106 = vrot.lane.b32.xlu0 %v2104_v35, %s3733_s12  ;;  %v3130_v38 = vpop.f32.mrb[43].mxu1 }
 0xcc7   : > { %v2107_v40 = vpop.permute.xlu0 %2106 }
 0xcc8   : > { %2110 = vst.msk [vmem:[#allocation3] sm:$0xff] %vm2109_vm8, %v2107_v40 }
 0xccf   : > { %v2111_v41 = vld [vmem:[#allocation3] sm:$0xff] }
 0xcd0   : > { %3148 = vmatmul.mubr.bf16.vlgmr.msra.gmra.mrb[28].mxu0 %v2111_v41 }
 0xcd1   : > { %3187 = vmatprep.mubr.msk.bf16.mxu0 %vm3732_vm2, %v3731_v13  ;;  %3172 = vmatpush3.bf16.msra.mxu0 %v3367_v61 }
 0xcd2   : > { %3173 = vmatprep.subr.bf16.mxu0 %v3731_v13 }
 0xcd5   : > { %3174 = vmatpush3.bf16.msra.mxu0 %v3368_v4 }
 0xcd6   : > { %3175 = vmatprep.subr.bf16.mxu0 %v3731_v13 }
 0xcd9   : > { %3176 = vmatpush3.bf16.msra.mxu0 %v3369_v21 }
 0xcda   : > { %3177 = vmatprep.subr.bf16.mxu0 %v3731_v13 }
 0xcdd   : > { %3178 = vmatpush3.bf16.msra.mxu0 %v3370_v22 }
 0xcde   : > { %3179 = vmatprep.subr.bf16.mxu0 %v3731_v13 }
 0xce1   : > { %3180 = vmatpush3.bf16.msra.mxu0 %v3371_v23 }
 0xce2   : > { %3181 = vmatprep.subr.bf16.mxu0 %v3731_v13 }
 0xce5   : > { %3182 = vmatpush3.bf16.msra.mxu0 %v3372_v24 }
 0xce6   : > { %3183 = vmatprep.subr.bf16.mxu0 %v3731_v13 }
 0xce9   : > { %3184 = vmatpush3.bf16.msra.mxu0 %v3373_v25 }
 0xcea   : > { %3185 = vmatprep.subr.bf16.mxu0 %v3731_v13 }
 0xced   : > { %3186 = vmatpush3.bf16.msra.mxu0 %v3374_v26 }
 0xda3   : > { %v2217_v43 = vpop.f32.mrb[28].mxu0 }
 0xda4   : > { %v2218_v44 = vadd.f32 %v2894_v42, %v2217_v43  ;;  %v3149_v45 = vpop.f32.mrb[29].mxu0 }
 0xda5   : > { %v2220_v46 = vpop.f32.mrb[30].mxu0 }
 0xda6   : > { %v2221_v48 = vadd.f32 %v2894_v42, %v2220_v46  ;;  %v3150_v49 = vpop.f32.mrb[31].mxu0  ;;  %v2224_v50 = vadd.f32 %v2218_v44, %v4213_v33 }
 0xda8   : > { %2228 = vadd.xlane.f32.xlu1 %v2224_v50  ;;  %v2225_v54 = vadd.f32 %v2221_v48, %v4215_v34  ;;  %v3360_v34 = vld [vmem:[%s4141_s15 + $0x8] sm:$0xff]   ;;  %s4647_s15 = scalar_lea.vmem %s4646_s18, %s4149_s25 }
 0xda9   : > { %3154 = vmatpush3.bf16.msra.mxu1 %v3360_v34  ;;  %v2903_v12 = vld [vmem:[%s4647_s15] ss:$0 sm:$0xff] }
 0xdaa   : > { %2230 = vadd.xlane.f32.xlu0 %v2225_v54  ;;  %3155 = vmatprep.subr.bf16.mxu1 %v3731_v13 }
 0xdad   : > { %3156 = vmatpush3.bf16.msra.mxu1 %v3361_v2 }
 0xdae   : > { %3157 = vmatprep.subr.bf16.mxu1 %v3731_v13 }
 0xdb1   : > { %3158 = vmatpush3.bf16.msra.mxu1 %v3362_v8 }
 0xdb2   : > { %3159 = vmatprep.subr.bf16.mxu1 %v3731_v13 }
 0xdb5   : > { %3160 = vmatpush3.bf16.msra.mxu1 %v3363_v16 }
 0xdb6   : > { %3161 = vmatprep.subr.bf16.mxu1 %v3731_v13 }
 0xdb9   : > { %3162 = vmatpush3.bf16.msra.mxu1 %v3364_v3 }
 0xdba   : > { %3163 = vmatprep.subr.bf16.mxu1 %v3731_v13 }
 0xdbd   : > { %3164 = vmatpush3.bf16.msra.mxu1 %v3365_v5 }
 0xdbe   : > { %3165 = vmatprep.subr.bf16.mxu1 %v3731_v13 }
 0xdc1   : > { %3166 = vmatpush3.bf16.msra.mxu1 %v3366_v6 }
 0xe35   : > { %v2229_v58 = vpop.xlane.xlu1 %2228 }
 0xe36   : > { %v2233_v59 = vmul.f32 0.0078125, %v2229_v58 }
 0xe37   : > { %v2231_v60 = vpop.xlane.xlu0 %2230 }
 0xe38   : > { %v2235_v62 = vsub.f32 %v2224_v50, %v2233_v59  ;;  %v2234_v63 = vmul.f32 0.0078125, %v2231_v60  ;;  %v2914_v60 = vld [vmem:[%s843_s21] ss:$0 sm:$0xff] }
 0xe3a   : > { %v2236_v0 = vsub.f32 %v2225_v54, %v2234_v63  ;;  %v2237_v1 = vmul.f32 %v2235_v62, %v2235_v62 }
 0xe3c   : > { %2239 = vadd.xlane.f32.xlu0 %v2237_v1  ;;  %v2238_v33 = vmul.f32 %v2236_v0, %v2236_v0 }
 0xe40   : > { %2241 = vadd.xlane.f32.xlu0 %v2238_v33 }
 0xec9   : > { %v2240_v7 = vpop.xlane.xlu0 %2239 }
 0xeca   : > { %v2243_v9 = vmul.f32 0.0078125, %v2240_v7 }
 0xecc   : > { %v2245_v10 = vadd.f32 1e-05, %v2243_v9 }
 0xecd   : > { %v2242_v39 = vpop.xlane.xlu0 %2241 }
 0xece   : > { %3407 = vrsqrt.f32 %v2245_v10  ;;  %v2244_v47 = vmul.f32 0.0078125, %v2242_v39 }
 0xed0   : > { %v2246_v51 = vadd.f32 1e-05, %v2244_v47 }
 0xed2   : > { %3409 = vrsqrt.f32 %v2246_v51 }
 0xed8   : > { %v3408_v53 = vpop.eup %3407 }
 0xed9   : > { %v2249_v11 = vmul.f32 %v3408_v53, %v2235_v62 }
 0xedb   : > { %v2257_v17 = vmul.f32 %v2903_v12, %v2249_v11 }
 0xedc   : > { %v3410_v14 = vpop.eup %3409 }
 0xedd   : > { %v2250_v15 = vmul.f32 %v3410_v14, %v2236_v0  ;;  %v4466_v52 = vadd.f32 %v2904_v18, %v2257_v17  ;;  %v2923_v17 = vld [vmem:[%s834_s6] ss:$0 sm:$0xff] }
 0xedf   : > { %v2258_v19 = vmul.f32 %v2903_v12, %v2250_v15 }
 0xee1   : > { %v4468_v56 = vadd.f32 %v2904_v18, %v2258_v19 }
 0xee3   : > { %v2267_v20 = vpack.c.bf16 %v4468_v56, %v4466_v52 }
 0xee5   : > { %3168 = vmatmul.mubr.bf16.vlgmr.msra.gmra.mrb[44].mxu1 %v2267_v20 }
 0xfb8   : > { %v2373_v28 = vpop.f32.mrb[44].mxu1 }
 0xfb9   : > { %v2374_v29 = vadd.f32 %v2905_v27, %v2373_v28  ;;  %v3169_v30 = vpop.f32.mrb[45].mxu1 }
 0xfba   : > { %v2376_v31 = vpop.f32.mrb[46].mxu1 }
 0xfbb   : > { %v2382_v57 = vmul.f32 0.044715, %v2374_v29  ;;  %v2377_v32 = vadd.f32 %v2905_v27, %v2376_v31  ;;  %v3170_v35 = vpop.f32.mrb[47].mxu1  ;;  %v2380_v49 = vmul.f32 0.5, %v2374_v29 }
 0xfbd   : > { %v2384_v36 = vmul.f32 %v2382_v57, %v2374_v29  ;;  %v2383_v37 = vmul.f32 0.044715, %v2377_v32  ;;  %v2381_v50 = vmul.f32 0.5, %v2377_v32 }
 0xfbf   : > { %v2386_v38 = vmul.f32 %v2384_v36, %v2374_v29  ;;  %v2385_v40 = vmul.f32 %v2383_v37, %v2377_v32 }
 0xfc1   : > { %v2388_v41 = vadd.f32 %v2386_v38, %v2374_v29  ;;  %v2387_v42 = vmul.f32 %v2385_v40, %v2377_v32 }
 0xfc3   : > { %v2390_v13 = vmul.f32 0.7978846, %v2388_v41  ;;  %v2389_v43 = vadd.f32 %v2387_v42, %v2377_v32 }
 0xfc5   : > { %3411 = vtanh.f32 %v2390_v13  ;;  %v2391_v44 = vmul.f32 0.7978846, %v2389_v43 }
 0xfc7   : > { %3413 = vtanh.f32 %v2391_v44 }
 0xfcf   : > { %v3412_v45 = vpop.eup %3411 }
 0xfd0   : > { %v2394_v46 = vadd.f32 1.0, %v3412_v45 }
 0xfd1   : > { %v3414_v48 = vpop.eup %3413 }
 0xfd2   : > { %v2395_v54 = vadd.f32 1.0, %v3414_v48  ;;  %v2396_v55 = vmul.f32 %v2394_v46, %v2380_v49 }
 0xfd4   : > { %v2397_v58 = vmul.f32 %v2395_v54, %v2381_v50 }
 0xfd6   : > { %v2398_v59 = vpack.c.bf16 %v2397_v58, %v2396_v55 }
 0xfd8   : > { %3188 = vmatmul.mubr.bf16.vlgmr.msra.gmra.mrb[32].mxu0 %v2398_v59 }
0x10ab   : > { %v2504_v62 = vpop.f32.mrb[32].mxu0 }
0x10ac   : > { %v2505_v63 = vadd.f32 %v2914_v60, %v2504_v62  ;;  %v3189_v0 = vpop.f32.mrb[33].mxu0 }
0x10ad   : > { %v2507_v1 = vpop.f32.mrb[34].mxu0 }
0x10ae   : > { %v2508_v33 = vadd.f32 %v2914_v60, %v2507_v1  ;;  %v3190_v34 = vpop.f32.mrb[35].mxu0  ;;  %v2511_v2 = vadd.f32 %v2505_v63, %v4466_v52  ;;  %v2924_v52 = vld [vmem:[%s837_s4] ss:$0 sm:$0xff] }
0x10b0   : > { %2515 = vadd.xlane.f32.xlu1 %v2511_v2  ;;  %v2512_v8 = vadd.f32 %v2508_v33, %v4468_v56 }
0x10b2   : > { %2517 = vadd.xlane.f32.xlu0 %v2512_v8 }
0x113d   : > { %v2516_v16 = vpop.xlane.xlu1 %2515 }
0x113e   : > { %v2519_v3 = vmul.f32 0.0078125, %v2516_v16 }
0x113f   : > { %v2518_v5 = vpop.xlane.xlu0 %2517 }
0x1140   : > { %v2521_v6 = vsub.f32 %v2511_v2, %v2519_v3  ;;  %v2520_v7 = vmul.f32 0.0078125, %v2518_v5 }
0x1142   : > { %v2522_v9 = vsub.f32 %v2512_v8, %v2520_v7  ;;  %v2523_v10 = vmul.f32 %v2521_v6, %v2521_v6 }
0x1144   : > { %2525 = vadd.xlane.f32.xlu1 %v2523_v10  ;;  %v2524_v39 = vmul.f32 %v2522_v9, %v2522_v9 }
0x1146   : > { %2527 = vadd.xlane.f32.xlu0 %v2524_v39 }
0x11d1   : > { %v2526_v47 = vpop.xlane.xlu1 %2525 }
0x11d2   : > { %v2529_v51 = vmul.f32 0.0078125, %v2526_v47 }
0x11d3   : > { %v2528_v53 = vpop.xlane.xlu0 %2527 }
0x11d4   : > { %v2531_v11 = vadd.f32 1e-05, %v2529_v51  ;;  %v2530_v12 = vmul.f32 0.0078125, %v2528_v53 }
0x11d6   : > { %3415 = vrsqrt.f32 %v2531_v11  ;;  %v2532_v14 = vadd.f32 1e-05, %v2530_v12 }
0x11d8   : > { %3417 = vrsqrt.f32 %v2532_v14 }
0x11e0   : > { %v3416_v15 = vpop.eup %3415 }
0x11e1   : > { %v2535_v18 = vmul.f32 %v3416_v15, %v2521_v6 }
0x11e2   : > { %v3418_v19 = vpop.eup %3417 }
0x11e3   : > { %v2543_v56 = vmul.f32 %v2923_v17, %v2535_v18  ;;  %v2536_v20 = vmul.f32 %v3418_v19, %v2522_v9  ;;  %2558 = sbr.rel (%p2925_p3) target bundleno = 4586 (0x11ea), region = 120 }
0x11e5   : > { %v2551_v61 = vadd.f32 %v2924_v52, %v2543_v56  ;;  %v2544_v4 = vmul.f32 %v2923_v17, %v2536_v20 }
0x11e7   : > { %2553 = vst [vmem:[#allocation2] sm:$0xff] %v2551_v61  ;;  %v2552_v21 = vadd.f32 %v2924_v52, %v2544_v4  ;;  %2559 = vst [vmem:[#allocation16] sm:$0xff] (!%p2925_p3), %v2551_v61 }
0x11e9   : > { %2554 = vst [vmem:[#allocation2 + $0x8] sm:$0xff] %v2552_v21  ;;  %2560 = vst [vmem:[#allocation16 + $0x8] sm:$0xff] (!%p2925_p3), %v2552_v21 }
0x11ea PF: > { %p3249_p11 = scmp.eq.s32.totalorder %s3853_s27, 1  ;;  %s3736_s6 = smov [#allocation16]  }
0x11eb   : > { %s2570_s1 = sshll.u32 %s3736_s6, 4  ;;  %s2571_s1 = int_to_ptr.vmem [resolvable:$true] %s2570_s1 }
0x11ec   : > { %s3623_s25 = scalar_lea.vmem %s2571_s1, 256  ;;  %p3630_p7 = scmp.lt.s32.totalorder %s2571_s1, %s2571_s1 }
0x11ed   : > { %p3624_p13 = scmp.ne.s32.totalorder %s2571_s1, %s3623_s25  ;;  %p3631_p0 = scmp.lt.s32.totalorder %s3623_s25, %s3623_s25 }
0x11ef   : > { %p3625_p2 = pnand %p3624_p13, %p3249_p11  ;;  %p3632_p6 = por %p3631_p0, %p3630_p7 }
0x11f1   : > { %p3626_p1 = pneg %p3625_p2 }
0x11f3   : > { %p3633_p9 = pnand %p3632_p6, %p3626_p1 }
0x11f5   : > { %3636 = shalt.err (!%p3633_p9)
}
0x11f6   : > { %s4654_s23 = sld [smem:[#allocation42_spill]] }
0x11fc   : > { %s4655_s16 = smov %s4654_s23  ;;  %s3637_s29 = scalar_lea.hbm %s4654_s23, 256 }
0x11fd   : > { %p3638_p4 = scmp.ne.s32.totalorder %s4655_s16, %s3637_s29  ;;  %p3643_p10 = scmp.lt.u32.totalorder %s3637_s29, %s4655_s16 }
0x11ff   : > { %p3639_p5 = pnand %p3638_p4, %p3249_p11 }
0x1201   : > { %p3640_p12 = pneg %p3639_p5 }
0x1203   : > { %p3645_p8 = pnand %p3643_p10, %p3640_p12 }
0x1205   : > { %3648 = shalt.err (!%p3645_p8)
}
0x1206   : > { %s3737_s28 = smov 128   ;;  %s3738_s19 = smov 8  }
0x1207   : > { %3216 = dma.vmem_to_hbm [thread:$0]  (%p3249_p11), %s2571_s1, 256, %s4655_s16, [#allocation6], %s3737_s28, %s3737_s28, %s3738_s19  }
0x1208   : > { %3690 = dma.done.wait (%p3249_p11), [#allocation6], 256  }
0x1209   : > { %3692 = vsyncadd (%p3249_p11), [#allocation6], 4294967040 }
0x120a PF: > { %s4656_s3 = sld [smem:[#allocation24_spill]]  ;;  %s4657_s10 = sld [smem:[#allocation22_spill]] }
0x120b   : > { %s4658_s23 = sld [smem:[#allocation26_spill]]  ;;  %s4659_s24 = sld [smem:[#allocation23_spill]] }
0x120c   : > { %s4660_s25 = sld [smem:[#allocation25_spill]]  ;;  %s4661_s21 = smov %s3699_s22 }
0x1210   : > { %s35_s26 = sadd.s32 1, %s4656_s3   ;;  %s4662_s22 = smov %s4657_s10 }
0x1211   : > { %p32_p3 = scmp.ge.s32.totalorder %s35_s26, 4  }
0x1213   :  { %34 = sbr.rel (!%p32_p3) target bundleno = 26 (0x1a), region = 206 }
0x121a   :  { %2586 = vsyncpa [#allocation5], 1 }
0x121b   :  { %2588 = vsyncpa [#allocation5 + $0x1], 1 }
0x121c   :  { %2589 = vsyncpa [#allocation8], 1 }
0x121d   :  { %2590 = vsyncpa [#allocation11], 1 }
0x121e   :  { %2592 = vsyncpa [#allocation11 + $0x1], 1 }
0x121f   :  { %2593 = vsyncpa [#allocation14], 1 }
0x1220   :  { %2595 = vsyncpa [#allocation14 + $0x1], 1 }
0x1221   :  { %2596 = vsyncpa [#allocation6], 1 }
0x1222   :  { %2598 = vsyncpa [#allocation6 + $0x1], 1 }

</bundles_post_ra>
